<compile_context>
chip_gen: v7x
topology: tpu7x:2x2x1
jax: 0.10.0
libtpu: 0.0.40
codegen_flags: <defaults>
</compile_context>

<pallas_src>
import functools

import jax
import jax.numpy as jnp
from jax import lax
from jax.experimental import pallas as pl
from jax.experimental.pallas import tpu as pltpu

KSIZE = 15           # conv15x1
HALF = KSIZE // 2    # 7  ("same" zero padding)
H_EXT = 8            # halo kept on the in-VMEM intermediate h (>= HALF, lane friendly)
EXT = HALF + H_EXT   # 15 extra x lanes needed on each side of a tile


def _conv_taps(src, w_mat, off, width, c_src, use_im2col):
    """sum_k  w_mat[:, k*C:(k+1)*C] @ src[:, off+k : off+k+width].

    src: (C_src, S) slab (any float dtype; cast once to bf16 MXU operands here),
    w_mat: (C_out, KSIZE*C_src) bf16.  f32 accumulation.  Returns (C_out, width) f32.
    """
    src_bf = src.astype(jnp.bfloat16)
    if use_im2col:
        # Stack the 15 taps along the contraction dim -> ONE MXU matmul with K = 15*C
        # instead of 15 skinny (K = C) accumulating matmuls.
        cols = jnp.concatenate(
            [src_bf[:, off + k:off + k + width] for k in range(KSIZE)], axis=0)
        return jnp.dot(w_mat, cols, preferred_element_type=jnp.float32)
    acc = jnp.zeros((w_mat.shape[0], width), jnp.float32)
    for k in range(KSIZE):
        acc += jnp.dot(w_mat[:, k * c_src:(k + 1) * c_src],
                       src_bf[:, off + k:off + k + width],
                       preferred_element_type=jnp.float32)
    return acc


def _basic_block_kernel(xprev_ref, xcur_ref, xnext_ref,
                        w1_ref, s1_ref, b1_ref, w2_ref, s2_ref, b2_ref,
                        o_ref, *, use_im2col):
    """Fused conv15x1+BN+ReLU -> conv15x1+BN+residual+ReLU for one (batch, L-tile)."""
    i = pl.program_id(1)
    last = pl.num_programs(1) - 1
    c = o_ref.shape[1]
    tl = o_ref.shape[2]
    hw = xprev_ref.shape[2]
    wlen = tl + 2 * H_EXT

    # Haloed input slab (bf16): lanes = x[i*tl - EXT, i*tl + tl + EXT).  Only the EXT(=15)
    # needed lanes of each 128-lane halo block are spliced in; halo lanes outside the
    # sequence are zeroed -> conv zero padding.
    xcur = xcur_ref[0]                                            # (C, tl) f32 (residual)
    xl = jnp.where(i == 0, 0.0, xprev_ref[0, :, hw - EXT:])       # (C, EXT)
    xr = jnp.where(i == last, 0.0, xnext_ref[0, :, :EXT])         # (C, EXT)
    x_ext = jnp.concatenate(
        [xl.astype(jnp.bfloat16), xcur.astype(jnp.bfloat16), xr.astype(jnp.bfloat16)],
        axis=-1)                                                  # (C, tl + 30) bf16

    # Stage 1: conv1 + bn1 + relu over [i*tl - H_EXT, i*tl + tl + H_EXT) so stage 2 gets
    # its own 7-lane halo without another HBM round trip.
    acc1 = _conv_taps(x_ext, w1_ref[...], 0, wlen, c, use_im2col)
    h = jnp.maximum(acc1 * s1_ref[...] + b1_ref[...], 0.0)        # (C, tl + 16) f32
    # h must be exactly zero outside [0, L) (the zero padding the second conv sees in the
    # reference).  Since tl | L, only the first/last H_EXT columns of the first/last tile
    # can be out of range -> one cheap (1, W) lane-mask select.
    col = lax.broadcasted_iota(jnp.int32, (1, wlen), 1)
    keep = jnp.logical_and(jnp.logical_or(i != 0, col >= H_EXT),
                           jnp.logical_or(i != last, col < wlen - H_EXT))
    h = jnp.where(keep, h, 0.0)

    # Stage 2: conv2 + bn2 + residual + relu over [i*tl, i*tl + tl).
    acc2 = _conv_taps(h, w2_ref[...], H_EXT - HALF, tl, c, use_im2col)
    y = acc2 * s2_ref[...] + b2_ref[...] + xcur                   # residual from resident x
    o_ref[0] = jnp.maximum(y, 0.0).astype(o_ref.dtype)


def _fold_bn(conv_bias, gamma, beta, mean, var, eps=1e-5):
    """Fold conv bias + inference-mode BatchNorm into per-channel scale/bias."""
    inv_std = 1.0 / jnp.sqrt(var + eps)
    scale = gamma * inv_std
    bias = (conv_bias - mean) * scale + beta
    return scale, bias


def _prep_weight(w_oik):
    """(C_out, C_in, K) torch layout -> (C_out, K*C_in) bf16 matmul matrix."""
    c_out, c_in, k = w_oik.shape
    return jnp.transpose(w_oik, (0, 2, 1)).reshape(c_out, k * c_in).astype(jnp.bfloat16)


def _tpu_kind():
    try:
        return jax.devices()[0].device_kind.lower()
    except Exception:  # pragma: no cover
        return ""


def _vmem_estimate(c, tl, hw, use_im2col):
    """Rough VMEM working set (bytes) for one grid step (double-buffered I/O + temps)."""
    f32, bf16 = 4, 2
    wlen = tl + 2 * H_EXT
    weights = 2 * (c * KSIZE * c * bf16) * 2            # w1/w2, pipeline double-buffered
    io = 2 * (c * tl * f32) * 2                         # xcur + out, double-buffered
    io += 2 * (c * hw * f32) * 2                        # two halo blocks, double-buffered
    temps = c * (tl + 2 * EXT) * bf16                   # x_ext slab (bf16)
    temps += 3 * c * wlen * f32                         # h + acc1/acc2 slabs
    if use_im2col:
        temps += KSIZE * c * wlen * bf16                # im2col cols (bf16, stage 1)
    return weights + io + temps + (2 << 20)             # + compiler scratch headroom


def _choose_tile(length, c, n_batch, use_im2col, vmem_budget):
    """Largest lane tile (multiple of 128 dividing L) under the VMEM budget, keeping at
    least 2 total grid steps when possible so v7x's two TensorCores both get work."""
    if length % 128 != 0:
        # TODO(synk): awkward L falls back to a single un-tiled lane slab (no pipelining;
        #             may blow the VMEM budget for very long L).
        return length
    cands = [t for t in (4096, 2048, 1024, 512, 256, 128) if length % t == 0]
    feasible = [t for t in cands if _vmem_estimate(c, t, 128, use_im2col) <= vmem_budget]
    if not feasible:
        feasible = [cands[-1]]
    for t in feasible:
        if n_batch * (length // t) >= 2:
            return t
    return feasible[0]


def basic_block_forward(x_ncl, params, *, tl=None):
    """Fused Pallas BasicBlock forward (stride=1, downsample=None, inference-mode BN).

    x_ncl: (N, C, L) float32 in the PyTorch layout (C on sublanes, L on lanes).
    Returns (N, C, L) float32.
    """
    n_batch, c, length = x_ncl.shape
    c_out, c_in, k = params["conv1_w"].shape
    assert k == KSIZE and c_in == c and c_out == c, (
        "stride=1 / downsample=None BasicBlock requires in_channels == out_channels")
    assert length >= KSIZE, "sequence length must be >= kernel size"

    kind = _tpu_kind()
    is_v5e = ("v5e" in kind) or ("v5 lite" in kind) or ("v5litepod" in kind)
    is_v7 = "v7" in kind
    # One fat K=15*C contraction vs 15 skinny matmuls: 256-wide MXU on v6e/v7x prefers the
    # fat dot up to K~2048; v5e's 128-wide MXU keeps the 512 threshold.
    use_im2col = (KSIZE * c) <= (512 if is_v5e else 2048)
    # v7x has 64 MiB physical VMEM per TensorCore (v5e/v6e: 128 MiB) -> tighter budget/cap.
    vmem_budget = (32 << 20) if is_v7 else (64 << 20)
    vmem_cap = (48 << 20) if is_v7 else (96 << 20)

    if tl is None:
        tl = _choose_tile(length, c, n_batch, use_im2col, vmem_budget)
    assert length % tl == 0, "L must be a multiple of the lane tile"
    num_tiles = length // tl
    if num_tiles > 1:
        assert tl % 128 == 0, "L tiles must be lane-aligned (multiple of 128)"
    hw = 128 if (length % 128 == 0) else tl    # halo block width (>= EXT, lane aligned)
    r = tl // hw
    n_halo_blocks = length // hw

    w1 = _prep_weight(params["conv1_w"])
    w2 = _prep_weight(params["conv2_w"])
    s1, b1 = _fold_bn(params["conv1_b"], params["bn1_gamma"], params["bn1_beta"],
                      params["bn1_mean"], params["bn1_var"])
    s2, b2 = _fold_bn(params["conv2_b"], params["bn2_gamma"], params["bn2_beta"],
                      params["bn2_mean"], params["bn2_var"])
    s1 = s1.reshape(c, 1).astype(jnp.float32)
    b1 = b1.reshape(c, 1).astype(jnp.float32)
    s2 = s2.reshape(c, 1).astype(jnp.float32)
    b2 = b2.reshape(c, 1).astype(jnp.float32)

    kernel = functools.partial(_basic_block_kernel, use_im2col=use_im2col)

    # TODO(synk): w1/s1/b1/w2/s2/b2 are still pipeline double-buffered (their index_map is
    #             constant so they never re-DMA); single-buffering would halve their VMEM
    #             at large C once pl.Buffered(1) on pallas_call specs is safe to rely on.
    in_specs = [
        # left halo block (previous hw lanes of x; zeroed in-kernel for the first tile)
        pl.BlockSpec((1, c, hw), lambda n, i: (n, 0, jnp.maximum(i * r - 1, 0))),
        # current tile (conv input + residual)
        pl.BlockSpec((1, c, tl), lambda n, i: (n, 0, i)),
        # right halo block (next hw lanes of x; zeroed in-kernel for the last tile)
        pl.BlockSpec((1, c, hw),
                     lambda n, i: (n, 0, jnp.minimum((i + 1) * r, n_halo_blocks - 1))),
        pl.BlockSpec((c, KSIZE * c), lambda n, i: (0, 0)),    # w1 (bf16)
        pl.BlockSpec((c, 1), lambda n, i: (0, 0)),            # bn1 scale
        pl.BlockSpec((c, 1), lambda n, i: (0, 0)),            # bn1 bias (+conv1 bias)
        pl.BlockSpec((c, KSIZE * c), lambda n, i: (0, 0)),    # w2 (bf16)
        pl.BlockSpec((c, 1), lambda n, i: (0, 0)),            # bn2 scale
        pl.BlockSpec((c, 1), lambda n, i: (0, 0)),            # bn2 bias (+conv2 bias)
    ]

    est = _vmem_estimate(c, tl, hw, use_im2col)
    vmem_limit = int(min(vmem_cap, max(32 << 20, int(est * 1.5))))

    flops = 2 * 2 * n_batch * length * KSIZE * c * c          # two conv stages
    bytes_accessed = (n_batch * c * (length + num_tiles * 2 * hw) * 4   # x + halo re-reads
                      + n_batch * c * length * 4                        # output
                      + 2 * KSIZE * c * c * 2)                          # bf16 weights

    # TODO(synk): at C <= ~16 the MXU rows are <6% occupied; a VPU path (pltpu.roll lane
    #             shifts + broadcast FMA) would use otherwise-idle XLU/VALU slots.
    # TODO(synk): bf16 activations in/out would halve HBM traffic (biggest win on v5e) if
    #             the surrounding network tolerates it; kept f32 to match PyTorch exactly.
    return pl.pallas_call(
        kernel,
        out_shape=jax.ShapeDtypeStruct((n_batch, c, length), jnp.float32),
        grid=(n_batch, num_tiles),
        in_specs=in_specs,
        out_specs=pl.BlockSpec((1, c, tl), lambda n, i: (n, 0, i)),
        compiler_params=pltpu.CompilerParams(
            dimension_semantics=("parallel", "parallel"),
            vmem_limit_bytes=vmem_limit),
        cost_estimate=pl.CostEstimate(flops=flops, transcendentals=0,
                                      bytes_accessed=bytes_accessed),
    )(x_ncl, x_ncl, x_ncl, w1, s1, b1, w2, s2, b2)


# ---------------- pure-JAX reference (for validation only) ----------------

def _conv1d_ref(x_ncl, w_oik, b_o):
    y = lax.conv_general_dilated(
        x_ncl, w_oik, window_strides=(1,), padding=[(HALF, HALF)],
        dimension_numbers=("NCH", "OIH", "NCH"))
    return y + b_o[None, :, None]


def _bn_ref(x_ncl, gamma, beta, mean, var, eps=1e-5):
    inv = 1.0 / jnp.sqrt(var + eps)
    return (x_ncl - mean[None, :, None]) * (gamma * inv)[None, :, None] + beta[None, :, None]


def basic_block_ref(x_ncl, p, mxu_dtype=None):
    """Reference forward.  mxu_dtype=jnp.bfloat16 emulates the kernel's bf16 MXU operands
    (with f32 accumulation) for a tight numerical comparison."""
    if mxu_dtype is not None:
        q = lambda a: a.astype(mxu_dtype).astype(jnp.float32)
    else:
        q = lambda a: a
    out = _conv1d_ref(q(x_ncl), q(p["conv1_w"]), p["conv1_b"])
    out = _bn_ref(out, p["bn1_gamma"], p["bn1_beta"], p["bn1_mean"], p["bn1_var"])
    out = jnp.maximum(out, 0.0)
    out = _conv1d_ref(q(out), q(p["conv2_w"]), p["conv2_b"])
    out = _bn_ref(out, p["bn2_gamma"], p["bn2_beta"], p["bn2_mean"], p["bn2_var"])
    out = out + x_ncl
    return jnp.maximum(out, 0.0)


if __name__ == "__main__":
    # batch=2, channels=8 (in==out so downsample=None is valid), seq len=1024.
    N, C, L = 2, 8, 1024
    keys = jax.random.split(jax.random.PRNGKey(0), 13)
    params = {
        "conv1_w": jax.random.normal(keys[0], (C, C, KSIZE), jnp.float32) * 0.1,
        "conv1_b": jax.random.normal(keys[1], (C,), jnp.float32) * 0.1,
        "bn1_gamma": 1.0 + 0.1 * jax.random.normal(keys[2], (C,), jnp.float32),
        "bn1_beta": 0.1 * jax.random.normal(keys[3], (C,), jnp.float32),
        "bn1_mean": 0.1 * jax.random.normal(keys[4], (C,), jnp.float32),
        "bn1_var": jnp.abs(jax.random.normal(keys[5], (C,), jnp.float32)) + 0.5,
        "conv2_w": jax.random.normal(keys[6], (C, C, KSIZE), jnp.float32) * 0.1,
        "conv2_b": jax.random.normal(keys[7], (C,), jnp.float32) * 0.1,
        "bn2_gamma": 1.0 + 0.1 * jax.random.normal(keys[8], (C,), jnp.float32),
        "bn2_beta": 0.1 * jax.random.normal(keys[9], (C,), jnp.float32),
        "bn2_mean": 0.1 * jax.random.normal(keys[10], (C,), jnp.float32),
        "bn2_var": jnp.abs(jax.random.normal(keys[11], (C,), jnp.float32)) + 0.5,
    }
    x = jax.random.normal(keys[12], (N, C, L), jnp.float32)

    ref_bf16 = jax.block_until_ready(basic_block_ref(x, params, mxu_dtype=jnp.bfloat16))
    ref_f32 = jax.block_until_ready(basic_block_ref(x, params))

    # 1) auto tile selection: largest VMEM-fitting lane tile (here a single 1024-lane tile
    #    per batch element -> 2 grid steps from the batch dim, good for v7x's 2 TCs).
    out_auto = jax.block_until_ready(jax.jit(basic_block_forward)(x, params))
    # 2) forced small tile: exercises interior tiles and both boundary halo paths.
    out_small = jax.block_until_ready(
        jax.jit(functools.partial(basic_block_forward, tl=128))(x, params))

    for out in (out_auto, out_small):
        assert out.shape == (N, C, L), out.shape
        err_tight = float(jnp.max(jnp.abs(out - ref_bf16)))   # same numerics as the kernel
        err_exact = float(jnp.max(jnp.abs(out - ref_f32)))    # true f32 module semantics
        assert err_tight < 3e-2, f"mismatch vs bf16-emulating reference: {err_tight}"
        assert err_exact < 2e-1, f"mismatch vs exact f32 reference: {err_exact}"
    print("KERNEL_OK")
</pallas_src>

<mosaic_0001>
module attributes {stable_mosaic.version = 11 : i64} {
  func.func @_basic_block_kernel(%arg0: i32, %arg1: i32, %arg2: memref<1x8x128xf32, #tpu.memory_space<vmem>>, %arg3: memref<1x8x1024xf32, #tpu.memory_space<vmem>>, %arg4: memref<1x8x128xf32, #tpu.memory_space<vmem>>, %arg5: memref<8x120xbf16, #tpu.memory_space<vmem>>, %arg6: memref<8x1xf32, #tpu.memory_space<vmem>>, %arg7: memref<8x1xf32, #tpu.memory_space<vmem>>, %arg8: memref<8x120xbf16, #tpu.memory_space<vmem>>, %arg9: memref<8x1xf32, #tpu.memory_space<vmem>>, %arg10: memref<8x1xf32, #tpu.memory_space<vmem>>, %arg11: memref<1x8x1024xf32, #tpu.memory_space<vmem>>) attributes {dimension_semantics = [#tpu.dimension_semantics<parallel>, #tpu.dimension_semantics<parallel>], iteration_bounds = array<i64: 2, 1>, scalar_prefetch = 0 : i64, scratch_operands = 0 : i64, tpu.core_type = #tpu.core_type<tc>, window_params = [{transform_indices = @transform_0, window_bounds = array<i64: 1, 8, 128>}, {transform_indices = @transform_1, window_bounds = array<i64: 1, 8, 1024>}, {transform_indices = @transform_2, window_bounds = array<i64: 1, 8, 128>}, {pipeline_mode = #tpu.pipeline_mode<synchronous>, transform_indices = @transform_3, window_bounds = array<i64: 8, 120>}, {pipeline_mode = #tpu.pipeline_mode<synchronous>, transform_indices = @transform_4, window_bounds = array<i64: 8, 1>}, {pipeline_mode = #tpu.pipeline_mode<synchronous>, transform_indices = @transform_5, window_bounds = array<i64: 8, 1>}, {pipeline_mode = #tpu.pipeline_mode<synchronous>, transform_indices = @transform_6, window_bounds = array<i64: 8, 120>}, {pipeline_mode = #tpu.pipeline_mode<synchronous>, transform_indices = @transform_7, window_bounds = array<i64: 8, 1>}, {pipeline_mode = #tpu.pipeline_mode<synchronous>, transform_indices = @transform_8, window_bounds = array<i64: 8, 1>}, {transform_indices = @transform_9, window_bounds = array<i64: 1, 8, 1024>}]} {
    %c0 = arith.constant 0 : index
    %c0_0 = arith.constant 0 : index
    %c0_1 = arith.constant 0 : index
    %0 = vector.load %arg3[%c0, %c0_0, %c0_1] : memref<1x8x1024xf32, #tpu.memory_space<vmem>>, vector<1x8x1024xf32>
    %1 = vector.shape_cast %0 : vector<1x8x1024xf32> to vector<8x1024xf32>
    %c0_i32 = arith.constant 0 : i32
    %2 = arith.cmpi eq, %arg1, %c0_i32 : i32
    %c0_2 = arith.constant 0 : index
    %c0_3 = arith.constant 0 : index
    %c113 = arith.constant 113 : index
    %3 = vector.load %arg2[%c0_2, %c0_3, %c113] : memref<1x8x128xf32, #tpu.memory_space<vmem>>, vector<1x8x15xf32>
    %4 = vector.shape_cast %3 : vector<1x8x15xf32> to vector<8x15xf32>
    %cst = arith.constant 0.000000e+00 : f32
    %5 = vector.broadcast %cst : f32 to vector<8x15xf32>
    %6 = arith.select %2, %5, %4 : vector<8x15xf32>
    %c0_i32_4 = arith.constant 0 : i32
    %7 = arith.cmpi eq, %arg1, %c0_i32_4 : i32
    %c0_5 = arith.constant 0 : index
    %c0_6 = arith.constant 0 : index
    %c0_7 = arith.constant 0 : index
    %8 = vector.load %arg4[%c0_5, %c0_6, %c0_7] : memref<1x8x128xf32, #tpu.memory_space<vmem>>, vector<1x8x15xf32>
    %9 = vector.shape_cast %8 : vector<1x8x15xf32> to vector<8x15xf32>
    %cst_8 = arith.constant 0.000000e+00 : f32
    %10 = vector.broadcast %cst_8 : f32 to vector<8x15xf32>
    %11 = arith.select %7, %10, %9 : vector<8x15xf32>
    %12 = arith.truncf %6 : vector<8x15xf32> to vector<8x15xbf16>
    %13 = arith.truncf %1 : vector<8x1024xf32> to vector<8x1024xbf16>
    %14 = arith.truncf %11 : vector<8x15xf32> to vector<8x15xbf16>
    %15 = tpu.concatenate %12, %13, %14 in 1 : vector<8x15xbf16>, vector<8x1024xbf16>, vector<8x15xbf16> -> vector<8x1054xbf16>
    %c0_9 = arith.constant 0 : index
    %c0_10 = arith.constant 0 : index
    %16 = vector.load %arg5[%c0_9, %c0_10] : memref<8x120xbf16, #tpu.memory_space<vmem>>, vector<8x120xbf16>
    %17 = vector.extract_strided_slice %15 {offsets = [0, 0], sizes = [8, 1040], strides = [1, 1]} : vector<8x1054xbf16> to vector<8x1040xbf16>
    %18 = vector.extract_strided_slice %15 {offsets = [0, 1], sizes = [8, 1040], strides = [1, 1]} : vector<8x1054xbf16> to vector<8x1040xbf16>
    %19 = vector.extract_strided_slice %15 {offsets = [0, 2], sizes = [8, 1040], strides = [1, 1]} : vector<8x1054xbf16> to vector<8x1040xbf16>
    %20 = vector.extract_strided_slice %15 {offsets = [0, 3], sizes = [8, 1040], strides = [1, 1]} : vector<8x1054xbf16> to vector<8x1040xbf16>
    %21 = vector.extract_strided_slice %15 {offsets = [0, 4], sizes = [8, 1040], strides = [1, 1]} : vector<8x1054xbf16> to vector<8x1040xbf16>
    %22 = vector.extract_strided_slice %15 {offsets = [0, 5], sizes = [8, 1040], strides = [1, 1]} : vector<8x1054xbf16> to vector<8x1040xbf16>
    %23 = vector.extract_strided_slice %15 {offsets = [0, 6], sizes = [8, 1040], strides = [1, 1]} : vector<8x1054xbf16> to vector<8x1040xbf16>
    %24 = vector.extract_strided_slice %15 {offsets = [0, 7], sizes = [8, 1040], strides = [1, 1]} : vector<8x1054xbf16> to vector<8x1040xbf16>
    %25 = vector.extract_strided_slice %15 {offsets = [0, 8], sizes = [8, 1040], strides = [1, 1]} : vector<8x1054xbf16> to vector<8x1040xbf16>
    %26 = vector.extract_strided_slice %15 {offsets = [0, 9], sizes = [8, 1040], strides = [1, 1]} : vector<8x1054xbf16> to vector<8x1040xbf16>
    %27 = vector.extract_strided_slice %15 {offsets = [0, 10], sizes = [8, 1040], strides = [1, 1]} : vector<8x1054xbf16> to vector<8x1040xbf16>
    %28 = vector.extract_strided_slice %15 {offsets = [0, 11], sizes = [8, 1040], strides = [1, 1]} : vector<8x1054xbf16> to vector<8x1040xbf16>
    %29 = vector.extract_strided_slice %15 {offsets = [0, 12], sizes = [8, 1040], strides = [1, 1]} : vector<8x1054xbf16> to vector<8x1040xbf16>
    %30 = vector.extract_strided_slice %15 {offsets = [0, 13], sizes = [8, 1040], strides = [1, 1]} : vector<8x1054xbf16> to vector<8x1040xbf16>
    %31 = vector.extract_strided_slice %15 {offsets = [0, 14], sizes = [8, 1040], strides = [1, 1]} : vector<8x1054xbf16> to vector<8x1040xbf16>
    %32 = tpu.concatenate %17, %18, %19, %20, %21, %22, %23, %24, %25, %26, %27, %28, %29, %30, %31 in 0 : vector<8x1040xbf16>, vector<8x1040xbf16>, vector<8x1040xbf16>, vector<8x1040xbf16>, vector<8x1040xbf16>, vector<8x1040xbf16>, vector<8x1040xbf16>, vector<8x1040xbf16>, vector<8x1040xbf16>, vector<8x1040xbf16>, vector<8x1040xbf16>, vector<8x1040xbf16>, vector<8x1040xbf16>, vector<8x1040xbf16>, vector<8x1040xbf16> -> vector<120x1040xbf16>
    %cst_11 = arith.constant dense<0.000000e+00> : vector<8x1040xf32>
    %33 = tpu.matmul %16, %32, %cst_11 {dimension_numbers = #tpu.dot_dimension_numbers<[1], [0], [0], [1], [0, 0, 1, 1], [], []>} : vector<8x120xbf16>, vector<120x1040xbf16>, vector<8x1040xf32> -> vector<8x1040xf32>
    %c0_12 = arith.constant 0 : index
    %c0_13 = arith.constant 0 : index
    %34 = vector.load %arg6[%c0_12, %c0_13] : memref<8x1xf32, #tpu.memory_space<vmem>>, vector<8x1xf32>
    %35 = vector.broadcast %34 : vector<8x1xf32> to vector<8x1040xf32>
    %36 = arith.mulf %33, %35 : vector<8x1040xf32>
    %c0_14 = arith.constant 0 : index
    %c0_15 = arith.constant 0 : index
    %37 = vector.load %arg7[%c0_14, %c0_15] : memref<8x1xf32, #tpu.memory_space<vmem>>, vector<8x1xf32>
    %38 = vector.broadcast %37 : vector<8x1xf32> to vector<8x1040xf32>
    %39 = arith.addf %36, %38 : vector<8x1040xf32>
    %cst_16 = arith.constant 0.000000e+00 : f32
    %40 = vector.broadcast %cst_16 : f32 to vector<8x1040xf32>
    %41 = arith.maximumf %39, %40 : vector<8x1040xf32>
    %42 = tpu.iota {dimensions = array<i32: 1>} : vector<1x1040xi32>
    %c0_i32_17 = arith.constant 0 : i32
    %43 = arith.cmpi ne, %arg1, %c0_i32_17 : i32
    %c8_i32 = arith.constant 8 : i32
    %44 = vector.broadcast %c8_i32 : i32 to vector<1x1040xi32>
    %45 = arith.cmpi sge, %42, %44 : vector<1x1040xi32>
    %46 = vector.broadcast %43 : i1 to vector<1x1040xi1>
    %47 = arith.ori %46, %45 : vector<1x1040xi1>
    %c0_i32_18 = arith.constant 0 : i32
    %48 = arith.cmpi ne, %arg1, %c0_i32_18 : i32
    %c1032_i32 = arith.constant 1032 : i32
    %49 = vector.broadcast %c1032_i32 : i32 to vector<1x1040xi32>
    %50 = arith.cmpi slt, %42, %49 : vector<1x1040xi32>
    %51 = vector.broadcast %48 : i1 to vector<1x1040xi1>
    %52 = arith.ori %51, %50 : vector<1x1040xi1>
    %53 = arith.andi %47, %52 : vector<1x1040xi1>
    %cst_19 = arith.constant 0.000000e+00 : f32
    %54 = vector.shape_cast %53 : vector<1x1040xi1> to vector<1x1040xi1>
    %55 = vector.broadcast %54 : vector<1x1040xi1> to vector<8x1040xi1>
    %56 = vector.broadcast %cst_19 : f32 to vector<8x1040xf32>
    %57 = arith.select %55, %41, %56 : vector<8x1040xi1>, vector<8x1040xf32>
    %c0_20 = arith.constant 0 : index
    %c0_21 = arith.constant 0 : index
    %58 = vector.load %arg8[%c0_20, %c0_21] : memref<8x120xbf16, #tpu.memory_space<vmem>>, vector<8x120xbf16>
    %59 = arith.truncf %57 : vector<8x1040xf32> to vector<8x1040xbf16>
    %60 = vector.extract_strided_slice %59 {offsets = [0, 1], sizes = [8, 1024], strides = [1, 1]} : vector<8x1040xbf16> to vector<8x1024xbf16>
    %61 = vector.extract_strided_slice %59 {offsets = [0, 2], sizes = [8, 1024], strides = [1, 1]} : vector<8x1040xbf16> to vector<8x1024xbf16>
    %62 = vector.extract_strided_slice %59 {offsets = [0, 3], sizes = [8, 1024], strides = [1, 1]} : vector<8x1040xbf16> to vector<8x1024xbf16>
    %63 = vector.extract_strided_slice %59 {offsets = [0, 4], sizes = [8, 1024], strides = [1, 1]} : vector<8x1040xbf16> to vector<8x1024xbf16>
    %64 = vector.extract_strided_slice %59 {offsets = [0, 5], sizes = [8, 1024], strides = [1, 1]} : vector<8x1040xbf16> to vector<8x1024xbf16>
    %65 = vector.extract_strided_slice %59 {offsets = [0, 6], sizes = [8, 1024], strides = [1, 1]} : vector<8x1040xbf16> to vector<8x1024xbf16>
    %66 = vector.extract_strided_slice %59 {offsets = [0, 7], sizes = [8, 1024], strides = [1, 1]} : vector<8x1040xbf16> to vector<8x1024xbf16>
    %67 = vector.extract_strided_slice %59 {offsets = [0, 8], sizes = [8, 1024], strides = [1, 1]} : vector<8x1040xbf16> to vector<8x1024xbf16>
    %68 = vector.extract_strided_slice %59 {offsets = [0, 9], sizes = [8, 1024], strides = [1, 1]} : vector<8x1040xbf16> to vector<8x1024xbf16>
    %69 = vector.extract_strided_slice %59 {offsets = [0, 10], sizes = [8, 1024], strides = [1, 1]} : vector<8x1040xbf16> to vector<8x1024xbf16>
    %70 = vector.extract_strided_slice %59 {offsets = [0, 11], sizes = [8, 1024], strides = [1, 1]} : vector<8x1040xbf16> to vector<8x1024xbf16>
    %71 = vector.extract_strided_slice %59 {offsets = [0, 12], sizes = [8, 1024], strides = [1, 1]} : vector<8x1040xbf16> to vector<8x1024xbf16>
    %72 = vector.extract_strided_slice %59 {offsets = [0, 13], sizes = [8, 1024], strides = [1, 1]} : vector<8x1040xbf16> to vector<8x1024xbf16>
    %73 = vector.extract_strided_slice %59 {offsets = [0, 14], sizes = [8, 1024], strides = [1, 1]} : vector<8x1040xbf16> to vector<8x1024xbf16>
    %74 = vector.extract_strided_slice %59 {offsets = [0, 15], sizes = [8, 1024], strides = [1, 1]} : vector<8x1040xbf16> to vector<8x1024xbf16>
    %75 = tpu.concatenate %60, %61, %62, %63, %64, %65, %66, %67, %68, %69, %70, %71, %72, %73, %74 in 0 : vector<8x1024xbf16>, vector<8x1024xbf16>, vector<8x1024xbf16>, vector<8x1024xbf16>, vector<8x1024xbf16>, vector<8x1024xbf16>, vector<8x1024xbf16>, vector<8x1024xbf16>, vector<8x1024xbf16>, vector<8x1024xbf16>, vector<8x1024xbf16>, vector<8x1024xbf16>, vector<8x1024xbf16>, vector<8x1024xbf16>, vector<8x1024xbf16> -> vector<120x1024xbf16>
    %cst_22 = arith.constant dense<0.000000e+00> : vector<8x1024xf32>
    %76 = tpu.matmul %58, %75, %cst_22 {dimension_numbers = #tpu.dot_dimension_numbers<[1], [0], [0], [1], [0, 0, 1, 1], [], []>} : vector<8x120xbf16>, vector<120x1024xbf16>, vector<8x1024xf32> -> vector<8x1024xf32>
    %c0_23 = arith.constant 0 : index
    %c0_24 = arith.constant 0 : index
    %77 = vector.load %arg9[%c0_23, %c0_24] : memref<8x1xf32, #tpu.memory_space<vmem>>, vector<8x1xf32>
    %78 = vector.broadcast %77 : vector<8x1xf32> to vector<8x1024xf32>
    %79 = arith.mulf %76, %78 : vector<8x1024xf32>
    %c0_25 = arith.constant 0 : index
    %c0_26 = arith.constant 0 : index
    %80 = vector.load %arg10[%c0_25, %c0_26] : memref<8x1xf32, #tpu.memory_space<vmem>>, vector<8x1xf32>
    %81 = vector.broadcast %80 : vector<8x1xf32> to vector<8x1024xf32>
    %82 = arith.addf %79, %81 : vector<8x1024xf32>
    %83 = arith.addf %82, %1 : vector<8x1024xf32>
    %cst_27 = arith.constant 0.000000e+00 : f32
    %84 = vector.broadcast %cst_27 : f32 to vector<8x1024xf32>
    %85 = arith.maximumf %83, %84 : vector<8x1024xf32>
    %c0_28 = arith.constant 0 : index
    %c0_29 = arith.constant 0 : index
    %c0_30 = arith.constant 0 : index
    %86 = vector.load %arg11[%c0_28, %c0_29, %c0_30] : memref<1x8x1024xf32, #tpu.memory_space<vmem>>, vector<1x8x1024xf32>
    %87 = vector.shape_cast %86 : vector<1x8x1024xf32> to vector<8x1024xf32>
    %88 = vector.shape_cast %85 : vector<8x1024xf32> to vector<1x8x1024xf32>
    tpu.vector_store %arg11[%c0_28, %c0_29, %c0_30], %88 {strides = array<i32>} : memref<1x8x1024xf32, #tpu.memory_space<vmem>>, vector<1x8x1024xf32>,
    return
  }
  func.func @transform_0(%arg0: i32, %arg1: i32) -> (i32, i32, i32) {
    %c8_i32 = arith.constant 8 : i32
    %0 = arith.muli %arg1, %c8_i32 : i32
    %c1_i32 = arith.constant 1 : i32
    %1 = arith.subi %0, %c1_i32 : i32
    %c0_i32 = arith.constant 0 : i32
    %2 = arith.maxsi %1, %c0_i32 : i32
    %c0_i32_0 = arith.constant 0 : i32
    %c0_i32_1 = arith.constant 0 : i32
    return %arg0, %c0_i32_0, %2 : i32, i32, i32
  }
  func.func @transform_1(%arg0: i32, %arg1: i32) -> (i32, i32, i32) {
    %c0_i32 = arith.constant 0 : i32
    %c0_i32_0 = arith.constant 0 : i32
    return %arg0, %c0_i32, %arg1 : i32, i32, i32
  }
  func.func @transform_2(%arg0: i32, %arg1: i32) -> (i32, i32, i32) {
    %c1_i32 = arith.constant 1 : i32
    %0 = arith.addi %arg1, %c1_i32 : i32
    %c8_i32 = arith.constant 8 : i32
    %1 = arith.muli %0, %c8_i32 : i32
    %c7_i32 = arith.constant 7 : i32
    %2 = arith.minsi %1, %c7_i32 : i32
    %c0_i32 = arith.constant 0 : i32
    %c0_i32_0 = arith.constant 0 : i32
    return %arg0, %c0_i32, %2 : i32, i32, i32
  }
  func.func @transform_3(%arg0: i32, %arg1: i32) -> (i32, i32) {
    %c0_i32 = arith.constant 0 : i32
    %c0_i32_0 = arith.constant 0 : i32
    %c0_i32_1 = arith.constant 0 : i32
    return %c0_i32, %c0_i32_0 : i32, i32
  }
  func.func @transform_4(%arg0: i32, %arg1: i32) -> (i32, i32) {
    %c0_i32 = arith.constant 0 : i32
    %c0_i32_0 = arith.constant 0 : i32
    %c0_i32_1 = arith.constant 0 : i32
    return %c0_i32, %c0_i32_0 : i32, i32
  }
  func.func @transform_5(%arg0: i32, %arg1: i32) -> (i32, i32) {
    %c0_i32 = arith.constant 0 : i32
    %c0_i32_0 = arith.constant 0 : i32
    %c0_i32_1 = arith.constant 0 : i32
    return %c0_i32, %c0_i32_0 : i32, i32
  }
  func.func @transform_6(%arg0: i32, %arg1: i32) -> (i32, i32) {
    %c0_i32 = arith.constant 0 : i32
    %c0_i32_0 = arith.constant 0 : i32
    %c0_i32_1 = arith.constant 0 : i32
    return %c0_i32, %c0_i32_0 : i32, i32
  }
  func.func @transform_7(%arg0: i32, %arg1: i32) -> (i32, i32) {
    %c0_i32 = arith.constant 0 : i32
    %c0_i32_0 = arith.constant 0 : i32
    %c0_i32_1 = arith.constant 0 : i32
    return %c0_i32, %c0_i32_0 : i32, i32
  }
  func.func @transform_8(%arg0: i32, %arg1: i32) -> (i32, i32) {
    %c0_i32 = arith.constant 0 : i32
    %c0_i32_0 = arith.constant 0 : i32
    %c0_i32_1 = arith.constant 0 : i32
    return %c0_i32, %c0_i32_0 : i32, i32
  }
  func.func @transform_9(%arg0: i32, %arg1: i32) -> (i32, i32, i32) {
    %c0_i32 = arith.constant 0 : i32
    %c0_i32_0 = arith.constant 0 : i32
    return %arg0, %c0_i32, %arg1 : i32, i32, i32
  }
}

</mosaic_0001>

<bundles_post_ra>
// kernel: basic_block_forward.1
= control target key start
LH: loop header
LB: loop body
LE: loop exit
PB: predicated region body
PF: predicated region fallthrough
CT: control target
= control target key end

     0   :  { %s5132_s0 = inlined_call_operand.vmem [shape: f32[2,8,1024], index: 0, kind: input, shape index: {}, may-alias: {0,1,2}]   ;;  %s5133_s1 = inlined_call_operand.vmem [shape: f32[2,8,1024], index: 1, kind: input, shape index: {}, may-alias: {0,1,2}]   ;;  %s5134_s2 = inlined_call_operand.vmem [shape: f32[2,8,1024], index: 2, kind: input, shape index: {}, may-alias: {0,1,2}]   ;;  %s5135_s3 = inlined_call_operand.vmem [shape: bf16[8,120], index: 3, kind: input, shape index: {}]   ;;  %s5136_s4 = inlined_call_operand.vmem [shape: f32[8,1], index: 4, kind: input, shape index: {}]   ;;  %s5137_s5 = inlined_call_operand.vmem [shape: f32[8,1], index: 5, kind: input, shape index: {}]   ;;  %s5138_s6 = inlined_call_operand.vmem [shape: bf16[8,120], index: 6, kind: input, shape index: {}]   ;;  %s5139_s7 = inlined_call_operand.vmem [shape: f32[8,1], index: 7, kind: input, shape index: {}]   ;;  %s5140_s8 = inlined_call_operand.vmem [shape: f32[8,1], index: 8, kind: input, shape index: {}]   ;;  %s5141_s9 = inlined_call_operand.hbm [shape: f32[2,8,1024], index: 9, kind: output, shape index: {}]  }
   0x1   :  { %5192 = sst [smem:[#allocation27_spill]] %s5133_s1 }
   0x2   :  { %5193 = sst [smem:[#allocation28_spill]] %s5135_s3 }
   0x3   :  { %14 = vsyncpa [#allocation3], 0 }
   0x4   :  { %16 = vsyncpa [#allocation3 + $0x1], 0  ;;  %s3135_s28 = smov 0   ;;  %s3137_s29 = smov 0  }
   0x5   :  { %s3139_s30 = smov 0   ;;  %s3141_s10 = smov 0  }
   0x6   :  { %s3143_s11 = smov 0   ;;  %s3145_s12 = smov 0  }
   0x7 LB: > { %s2833_s13 = sadd.s32 4294967295, %s3063_s12   ;;  %s2834_s14 = sadd.s32 4294967294, %s3063_s12   ;;  %s3063_s12 = sphi %s3145_s12, %s22_s12   ;;  %s3059_s11 = sphi %s3143_s11, %s5261_s11   ;;  %s3055_s10 = sphi %s3141_s10, %s5260_s10   ;;  %s3051_s30 = sphi %s3139_s30, %s5259_s30   ;;  %s3047_s29 = sphi %s3137_s29, %s5258_s29   ;;  %s3043_s28 = sphi %s3135_s28, %s5257_s28  }
   0x8   : > { %s34_s15 = sadd.s32 1, %s3059_s11  ;;  %s269_s16 = sadd.s32 1, %s3051_s30 }
   0x9   : > { %p36_p0 = scmp.ge.s32.totalorder %s34_s15, 2  ;;  %p279_p1 = scmp.ne.s32.totalorder %s3051_s30, %s3047_s29 }
   0xa   : > { %p280_p2 = scmp.eq.s32.totalorder %s2833_s13, 1  ;;  %p285_p3 = scmp.ne.s32.totalorder %s3047_s29, %s3043_s28 }
   0xb   : > { %s5263_s15 = smov (%p36_p0, %s34_s15), 0  ;;  %p286_p5 = scmp.eq.s32.totalorder %s2834_s14, 1 }
   0xc   : > { %p3175_p4 = por %p280_p2, %p279_p1  ;;  %s264_s18 = ssub.s32 %s3059_s11, %s5263_s15 }
   0xd   : > { %p2837_p6 = scmp.ge.s32.totalorder %s3063_s12, 1  ;;  %p267_p7 = scmp.eq.s32.totalorder %s264_s18, 0 }
   0xe   : > { %p3182_p8 = por %p286_p5, %p285_p3  ;;  %p373_p9 = scmp.lt.s32.totalorder %s3063_s12, 3 }
   0xf   : > { %s3188_s20 = scalar_select %p267_p7, %s3051_s30, %s269_s16  }
  0x10   : > { %p374_p10 = pnand %p2837_p6, %p373_p9 }
  0x12   : > { %377 = sbr.rel (%p374_p10) target bundleno = 1448 (0x5a8), region = 56 }
  0x19   : > { %p454_p11 = scmp.lt.s32.totalorder %s3055_s10, 1  ;;  %v3065_v0 = vmov 0.0|0.0   ;;  %s3066_s21 = smov 15   ;;  %vm534_vm0 = vcmask 121856   ;;  %v5170_v35 = vmov 0   ;;  %vm582_vm1 = vcmask 1039360  }
  0x1a   : > { %508 = vrot.lane.b32.xlu1 %v3065_v0, %s3066_s21  ;;  %s5196_s1 = sld [smem:[#allocation27_spill]]  ;;  %s5144_s26 = smov 126   ;;  %1256 = vmatprep.mubr.bf16.mxu0 %v5170_v35  ;;  %vm942_vm2 = vcmask 1043456   ;;  %vm609_vm3 = vcmask 1031168   ;;  %vm636_vm4 = vcmask 1022976   ;;  %vm663_vm5 = vcmask 1014784  }
  0x1b   : > { %s455_s22 = scalar_select %p454_p11, %s3055_s10, 1  ;;  %1297 = vmatprep.mubr.bf16.mxu1 %v5170_v35  ;;  %2975 = vset.pattern.permute.xlu0 %v5170_v35  ;;  %vm690_vm6 = vcmask 1006592   ;;  %vm717_vm7 = vcmask 998400   ;;  %vm744_vm8 = vcmask 990208   ;;  %vm771_vm9 = vcmask 982016  }
  0x1c   : > { %s5166_s27 = smov 124   ;;  %s5168_s2 = smov 122   ;;  %2976 = vset.pattern.permute.xlu1 %v5170_v35  ;;  %vm798_vm10 = vcmask 973824   ;;  %vm825_vm11 = vcmask 965632   ;;  %vm852_vm12 = vcmask 957440   ;;  %vm879_vm13 = vcmask 949248  }
  0x1d   : > { %s2868_s23 = sshll.u32 %s455_s22, 6  ;;  %s5164_s13 = smov 120   ;;  %vm906_vm14 = vcmask 941056   ;;  %vm933_vm15 = vcmask 932864  }
  0x1e   : > { %s5162_s14 = smov 118   ;;  %s5152_s16 = smov 116  }
  0x1f   : > { %s5142_s18 = smov 114   ;;  %s5150_s22 = smov 125  }
  0x20   : > { %s3195_s25 = scalar_lea.vmem %s5196_s1, %s2868_s23  ;;  %s5160_s23 = smov 123  }
  0x21   : > { %v481_v1 = vld [vmem:[%s3195_s25] sm:$0xff]  ;;  %v483_v2 = vld [vmem:[%s3195_s25 + $0x10] sm:$0xff]  ;;  %v482_v3 = vld [vmem:[%s3195_s25 + $0x8] sm:$0xff]  ;;  %s5158_s24 = smov 121   ;;  %s5156_s0 = smov 119  }
  0x22   : > { %v498_v4 = vpack.c.bf16 %v481_v1, %v481_v1  ;;  %v500_v5 = vpack.c.bf16 %v483_v2, %v483_v2  ;;  %v485_v6 = vld [vmem:[%s3195_s25 + $0x20] sm:$0xff]  ;;  %v499_v7 = vpack.c.bf16 %v482_v3, %v482_v3  ;;  %v484_v9 = vld [vmem:[%s3195_s25 + $0x18] sm:$0xff]  ;;  %v487_v10 = vld [vmem:[%s3195_s25 + $0x30] sm:$0xff]  ;;  %s5199_s3 = sld [smem:[#allocation28_spill]]  ;;  %s5211_s1 = smov 120  }
  0x23   : > { %v502_v8 = vpack.c.bf16 %v485_v6, %v485_v6  ;;  %v501_v11 = vpack.c.bf16 %v484_v9, %v484_v9  ;;  %v504_v12 = vpack.c.bf16 %v487_v10, %v487_v10  ;;  %v486_v13 = vld [vmem:[%s3195_s25 + $0x28] sm:$0xff]  ;;  %v488_v14 = vld [vmem:[%s3195_s25 + $0x38] sm:$0xff] }
  0x24   : > { %518 = vrot.lane.b32.xlu0 %v498_v4, %s3066_s21  ;;  %522 = vrot.lane.b32.xlu1 %v500_v5, %s3066_s21  ;;  %v503_v15 = vpack.c.bf16 %v486_v13, %v486_v13  ;;  %v505_v16 = vpack.c.bf16 %v488_v14, %v488_v14 }
  0x28   : > { %520 = vrot.lane.b32.xlu0 %v499_v7, %s3066_s21  ;;  %526 = vrot.lane.b32.xlu1 %v502_v8, %s3066_s21 }
  0x2c   : > { %524 = vrot.lane.b32.xlu0 %v501_v11, %s3066_s21  ;;  %530 = vrot.lane.b32.xlu1 %v504_v12, %s3066_s21 }
  0x30   : > { %528 = vrot.lane.b32.xlu0 %v503_v15, %s3066_s21  ;;  %532 = vrot.lane.b32.xlu1 %v505_v16, %s3066_s21 }
  0x34   : > { %543 = vrot.lane.b32.xlu0 %v3065_v0, %s3066_s21  ;;  %s5148_s21 = smov 127  }
  0x8c   : > { %v509_v17 = vpop.permute.xlu1 %508 }
  0x96   : > { %v519_v18 = vpop.permute.xlu0 %518  ;;  %v523_v19 = vpop.permute.xlu1 %522 }
  0x97   : > { %v3216_v23 = vsel %vm534_vm0, %v509_v17, %v519_v18 }
  0x98   : > { %v555_v30 = vrot.slane %v3216_v23, 4 }
  0x9a   : > { %v521_v20 = vpop.permute.xlu0 %520  ;;  %v527_v27 = vpop.permute.xlu1 %526 }
  0x9b   : > { %v3206_v21 = vsel %vm534_vm0, %v519_v18, %v521_v20  ;;  %v3209_v22 = vsel %vm534_vm0, %v521_v20, %v523_v19 }
  0x9c   : > { %595 = vrot.lane.b32.xlu0 %v3209_v22, %s5144_s26  ;;  %593 = vrot.lane.b32.xlu1 %v3206_v21, %s5144_s26  ;;  %v556_v29 = vrot.slane %v3206_v21, 4  ;;  %v557_v31 = vrot.slane %v3209_v22, 4 }
  0x9e   : > { %v525_v24 = vpop.permute.xlu0 %524  ;;  %v3277_v33 = vpop.permute.xlu1 %530 }
  0x9f   : > { %v3243_v26 = vsel %vm534_vm0, %v523_v19, %v525_v24  ;;  %v3275_v32 = vsel %vm534_vm0, %v525_v24, %v527_v27 }
  0xa0   : > { %649 = vrot.lane.b32.xlu0 %v3209_v22, %s5166_s27  ;;  %591 = vrot.lane.b32.xlu1 %v3216_v23, %s5144_s26  ;;  %v3308_v36 = vrot.slane %v3243_v26, 4  ;;  %v3311_v37 = vrot.slane %v3275_v32, 4 }
  0xa2   : > { %v529_v25 = vpop.permute.xlu0 %528  ;;  %v3341_v41 = vpop.permute.xlu1 %532 }
  0xa3   : > { %v3250_v28 = vsel %vm534_vm0, %v527_v27, %v529_v25  ;;  %v3284_v34 = vsel %vm534_vm0, %v529_v25, %v3277_v33 }
  0xa4   : > { %703 = vrot.lane.b32.xlu0 %v3209_v22, %s5168_s2  ;;  %647 = vrot.lane.b32.xlu1 %v3206_v21, %s5166_s27  ;;  %v3318_v38 = vrot.slane %v3250_v28, 4  ;;  %v3321_v39 = vrot.slane %v3284_v34, 4 }
  0xa6   : > { %v3339_v40 = vpop.permute.xlu0 %543 }
  0xa8   : > { %757 = vrot.lane.b32.xlu0 %v3209_v22, %s5164_s13  ;;  %645 = vrot.lane.b32.xlu1 %v3216_v23, %s5166_s27 }
  0xac   : > { %811 = vrot.lane.b32.xlu0 %v3209_v22, %s5162_s14  ;;  %701 = vrot.lane.b32.xlu1 %v3206_v21, %s5168_s2 }
  0xb0   : > { %865 = vrot.lane.b32.xlu0 %v3209_v22, %s5152_s16  ;;  %699 = vrot.lane.b32.xlu1 %v3216_v23, %s5168_s2 }
  0xb4   : > { %917 = vrot.lane.b32.xlu0 %v3206_v21, %s5142_s18  ;;  %755 = vrot.lane.b32.xlu1 %v3206_v21, %s5164_s13 }
  0xb8   : > { %753 = vrot.lane.b32.xlu1 %v3216_v23, %s5164_s13  ;;  %597 = vrot.lane.b32.xlu0 %v3243_v26, %s5144_s26 }
  0xbc   : > { %809 = vrot.lane.b32.xlu1 %v3206_v21, %s5162_s14  ;;  %601 = vrot.lane.b32.xlu0 %v3250_v28, %s5144_s26 }
  0xc0   : > { %807 = vrot.lane.b32.xlu1 %v3216_v23, %s5162_s14  ;;  %566 = vrot.lane.b32.xlu0 %v556_v29, %s5148_s21 }
  0xc4   : > { %863 = vrot.lane.b32.xlu1 %v3206_v21, %s5152_s16  ;;  %564 = vrot.lane.b32.xlu0 %v555_v30, %s5148_s21 }
  0xc8   : > { %861 = vrot.lane.b32.xlu1 %v3216_v23, %s5152_s16  ;;  %622 = vrot.lane.b32.xlu0 %v557_v31, %s5150_s22 }
  0xcc   : > { %915 = vrot.lane.b32.xlu1 %v3216_v23, %s5142_s18  ;;  %618 = vrot.lane.b32.xlu0 %v555_v30, %s5150_s22 }
  0xd0   : > { %919 = vrot.lane.b32.xlu1 %v3209_v22, %s5142_s18  ;;  %676 = vrot.lane.b32.xlu0 %v557_v31, %s5160_s23  ;;  %s5154_s18 = smov 117  }
  0xd4   : > { %599 = vrot.lane.b32.xlu1 %v3275_v32, %s5144_s26  ;;  %672 = vrot.lane.b32.xlu0 %v555_v30, %s5160_s23 }
  0xd8   : > { %603 = vrot.lane.b32.xlu1 %v3284_v34, %s5144_s26  ;;  %730 = vrot.lane.b32.xlu0 %v557_v31, %s5158_s24  ;;  %s5146_s26 = smov 115  }
  0xdc   : > { %568 = vrot.lane.b32.xlu1 %v557_v31, %s5148_s21  ;;  %726 = vrot.lane.b32.xlu0 %v555_v30, %s5158_s24 }
  0xe0   : > { %620 = vrot.lane.b32.xlu1 %v556_v29, %s5150_s22  ;;  %784 = vrot.lane.b32.xlu0 %v557_v31, %s5156_s0 }
  0xe4   : > { %674 = vrot.lane.b32.xlu1 %v556_v29, %s5160_s23  ;;  %780 = vrot.lane.b32.xlu0 %v555_v30, %s5156_s0 }
  0xe8   : > { %728 = vrot.lane.b32.xlu1 %v556_v29, %s5158_s24  ;;  %838 = vrot.lane.b32.xlu0 %v557_v31, %s5154_s18 }
  0xec   : > { %782 = vrot.lane.b32.xlu1 %v556_v29, %s5156_s0  ;;  %834 = vrot.lane.b32.xlu0 %v555_v30, %s5154_s18 }
  0xf0   : > { %836 = vrot.lane.b32.xlu1 %v556_v29, %s5154_s18  ;;  %892 = vrot.lane.b32.xlu0 %v557_v31, %s5146_s26 }
  0xf4   : > { %890 = vrot.lane.b32.xlu1 %v556_v29, %s5146_s26  ;;  %888 = vrot.lane.b32.xlu0 %v555_v30, %s5146_s26 }
  0xf8   : > { %572 = vrot.lane.b32.xlu1 %v3311_v37, %s5148_s21  ;;  %570 = vrot.lane.b32.xlu0 %v3308_v36, %s5148_s21 }
  0xfc   : > { %576 = vrot.lane.b32.xlu1 %v3321_v39, %s5148_s21  ;;  %574 = vrot.lane.b32.xlu0 %v3318_v38, %s5148_s21 }
 0x100   : > { %626 = vrot.lane.b32.xlu1 %v3311_v37, %s5150_s22  ;;  %624 = vrot.lane.b32.xlu0 %v3308_v36, %s5150_s22 }
 0x104   : > { %630 = vrot.lane.b32.xlu1 %v3321_v39, %s5150_s22  ;;  %628 = vrot.lane.b32.xlu0 %v3318_v38, %s5150_s22 }
 0x108   : > { %653 = vrot.lane.b32.xlu1 %v3275_v32, %s5166_s27  ;;  %651 = vrot.lane.b32.xlu0 %v3243_v26, %s5166_s27 }
 0x10c   : > { %657 = vrot.lane.b32.xlu1 %v3284_v34, %s5166_s27  ;;  %655 = vrot.lane.b32.xlu0 %v3250_v28, %s5166_s27 }
 0x10e   : > { %v3347_v42 = vpop.permute.xlu1 %593  ;;  %v3349_v43 = vpop.permute.xlu0 %595 }
 0x10f   : > { %v611_v18 = vsel %vm609_vm3, %v3347_v42, %v3349_v43 }
 0x110   : > { %680 = vrot.lane.b32.xlu1 %v3311_v37, %s5160_s23  ;;  %678 = vrot.lane.b32.xlu0 %v3308_v36, %s5160_s23 }
 0x112   : > { %v3355_v44 = vpop.permute.xlu1 %591  ;;  %v3357_v45 = vpop.permute.xlu0 %649 }
 0x113   : > { %v610_v19 = vsel %vm609_vm3, %v3355_v44, %v3347_v42  ;;  %v3520_v42 = vsel %vm534_vm0, %v3341_v41, %v3339_v40 }
 0x114   : > { %684 = vrot.lane.b32.xlu1 %v3321_v39, %s5160_s23  ;;  %682 = vrot.lane.b32.xlu0 %v3318_v38, %s5160_s23 }
 0x116   : > { %v3363_v46 = vpop.permute.xlu1 %647  ;;  %v3365_v47 = vpop.permute.xlu0 %703 }
 0x117   : > { %v665_v29 = vsel %vm663_vm5, %v3363_v46, %v3357_v45 }
 0x118   : > { %707 = vrot.lane.b32.xlu1 %v3275_v32, %s5168_s2  ;;  %705 = vrot.lane.b32.xlu0 %v3243_v26, %s5168_s2 }
 0x11a   : > { %v3371_v48 = vpop.permute.xlu1 %645  ;;  %v3373_v49 = vpop.permute.xlu0 %757 }
 0x11b   : > { %v664_v30 = vsel %vm663_vm5, %v3371_v48, %v3363_v46 }
 0x11c   : > { %711 = vrot.lane.b32.xlu1 %v3284_v34, %s5168_s2  ;;  %709 = vrot.lane.b32.xlu0 %v3250_v28, %s5168_s2 }
 0x11e   : > { %v3379_v50 = vpop.permute.xlu1 %701  ;;  %v3381_v51 = vpop.permute.xlu0 %811 }
 0x11f   : > { %v719_v48 = vsel %vm717_vm7, %v3379_v50, %v3365_v47 }
 0x120   : > { %734 = vrot.lane.b32.xlu1 %v3311_v37, %s5158_s24  ;;  %732 = vrot.lane.b32.xlu0 %v3308_v36, %s5158_s24 }
 0x122   : > { %v3387_v52 = vpop.permute.xlu1 %699  ;;  %v3389_v53 = vpop.permute.xlu0 %865 }
 0x124   : > { %738 = vrot.lane.b32.xlu1 %v3321_v39, %s5158_s24  ;;  %736 = vrot.lane.b32.xlu0 %v3318_v38, %s5158_s24 }
 0x126   : > { %v3395_v54 = vpop.permute.xlu1 %755  ;;  %v3397_v55 = vpop.permute.xlu0 %917 }
 0x128   : > { %761 = vrot.lane.b32.xlu1 %v3275_v32, %s5164_s13  ;;  %759 = vrot.lane.b32.xlu0 %v3243_v26, %s5164_s13 }
 0x12a   : > { %v3403_v56 = vpop.permute.xlu1 %753  ;;  %v3405_v57 = vpop.permute.xlu0 %597 }
 0x12c   : > { %765 = vrot.lane.b32.xlu1 %v3284_v34, %s5164_s13  ;;  %763 = vrot.lane.b32.xlu0 %v3250_v28, %s5164_s13 }
 0x12e   : > { %v3411_v58 = vpop.permute.xlu1 %809  ;;  %v3413_v59 = vpop.permute.xlu0 %601 }
 0x130   : > { %788 = vrot.lane.b32.xlu1 %v3311_v37, %s5156_s0  ;;  %786 = vrot.lane.b32.xlu0 %v3308_v36, %s5156_s0 }
 0x132   : > { %v3419_v60 = vpop.permute.xlu1 %807  ;;  %v567_v61 = vpop.permute.xlu0 %566 }
 0x134   : > { %792 = vrot.lane.b32.xlu1 %v3321_v39, %s5156_s0  ;;  %790 = vrot.lane.b32.xlu0 %v3318_v38, %s5156_s0 }
 0x136   : > { %v3425_v62 = vpop.permute.xlu1 %863  ;;  %v565_v63 = vpop.permute.xlu0 %564 }
 0x137   : > { %v583_v10 = vsel %vm582_vm1, %v565_v63, %v567_v61 }
 0x138   : > { %815 = vrot.lane.b32.xlu1 %v3275_v32, %s5162_s14  ;;  %813 = vrot.lane.b32.xlu0 %v3243_v26, %s5162_s14  ;;  %v944_v15 = vsel %vm942_vm2, %v3216_v23, %v583_v10  ;;  %v773_v10 = vsel %vm771_vm9, %v3395_v54, %v3373_v49 }
 0x13a   : > { %v3431_v0 = vpop.permute.xlu1 %861  ;;  %v3433_v1 = vpop.permute.xlu0 %622 }
 0x13c   : > { %819 = vrot.lane.b32.xlu1 %v3284_v34, %s5162_s14  ;;  %817 = vrot.lane.b32.xlu0 %v3250_v28, %s5162_s14 }
 0x13e   : > { %v3439_v2 = vpop.permute.xlu1 %915  ;;  %v619_v3 = vpop.permute.xlu0 %618 }
 0x140   : > { %842 = vrot.lane.b32.xlu1 %v3311_v37, %s5154_s18  ;;  %840 = vrot.lane.b32.xlu0 %v3308_v36, %s5154_s18 }
 0x142   : > { %v3445_v4 = vpop.permute.xlu1 %919  ;;  %v3447_v5 = vpop.permute.xlu0 %676 }
 0x144   : > { %846 = vrot.lane.b32.xlu1 %v3321_v39, %s5154_s18  ;;  %844 = vrot.lane.b32.xlu0 %v3318_v38, %s5154_s18 }
 0x146   : > { %v3453_v6 = vpop.permute.xlu1 %599  ;;  %v673_v7 = vpop.permute.xlu0 %672 }
 0x148   : > { %869 = vrot.lane.b32.xlu1 %v3275_v32, %s5152_s16  ;;  %867 = vrot.lane.b32.xlu0 %v3243_v26, %s5152_s16 }
 0x14a   : > { %v3459_v8 = vpop.permute.xlu1 %603  ;;  %v3461_v9 = vpop.permute.xlu0 %730 }
 0x14c   : > { %873 = vrot.lane.b32.xlu1 %v3284_v34, %s5152_s16  ;;  %871 = vrot.lane.b32.xlu0 %v3250_v28, %s5152_s16  ;;  %s5200_s16 = smov 116  }
 0x14e   : > { %v3468_v11 = vpop.permute.xlu1 %568  ;;  %v727_v12 = vpop.permute.xlu0 %726 }
 0x14f   : > { %v584_v13 = vsel %vm582_vm1, %v567_v61, %v3468_v11  ;;  %v718_v61 = vsel %vm717_vm7, %v3387_v52, %v3379_v50  ;;  %v3543_v52 = vrot.slane %v3520_v42, 4 }
 0x150   : > { %896 = vrot.lane.b32.xlu1 %v3311_v37, %s5146_s26  ;;  %894 = vrot.lane.b32.xlu0 %v3308_v36, %s5146_s26  ;;  %v948_v14 = vsel %vm942_vm2, %v3206_v21, %v584_v13 }
 0x151   : > { %1224 = vmatprep.subr.bf16.mxu0 %v948_v14 }
 0x152   : > { %v621_v16 = vpop.permute.xlu1 %620  ;;  %1225 = vmatpush1.bf16.msra.mxu0 %v944_v15  ;;  %v3480_v17 = vpop.permute.xlu0 %784 }
 0x153   : > { %v637_v20 = vsel %vm636_vm4, %v619_v3, %v621_v16  ;;  %v638_v21 = vsel %vm636_vm4, %v621_v16, %v3433_v1 }
 0x154   : > { %900 = vrot.lane.b32.xlu1 %v3321_v39, %s5146_s26  ;;  %898 = vrot.lane.b32.xlu0 %v3318_v38, %s5146_s26  ;;  %v983_v23 = vsel %vm942_vm2, %v611_v18, %v638_v21  ;;  %v979_v24 = vsel %vm942_vm2, %v610_v19, %v637_v20  ;;  %s5197_s26 = smov 114   ;;  %v3515_v39 = vsel %vm534_vm0, %v3277_v33, %v3341_v41  ;;  %vm3083_vm0 = vmmov 0  }
 0x155   : > { %1226 = vmatprep.subr.bf16.mxu0 %v983_v23  ;;  %v3540_v50 = vrot.slane %v3515_v39, 4  ;;  %v826_v19 = vsel %vm825_vm11, %v3419_v60, %v3411_v58 }
 0x156   : > { %v675_v25 = vpop.permute.xlu1 %674  ;;  %1227 = vmatpush1.bf16.msra.mxu0 %v979_v24  ;;  %v781_v27 = vpop.permute.xlu0 %780 }
 0x157   : > { %v691_v31 = vsel %vm690_vm6, %v673_v7, %v675_v25  ;;  %v692_v36 = vsel %vm690_vm6, %v675_v25, %v3447_v5  ;;  %v881_v25 = vsel %vm879_vm13, %v3425_v62, %v3389_v53 }
 0x158   : > { %923 = vrot.lane.b32.xlu1 %v3275_v32, %s5197_s26  ;;  %921 = vrot.lane.b32.xlu0 %v3243_v26, %s5197_s26  ;;  %v1019_v37 = vsel %vm942_vm2, %v665_v29, %v692_v36  ;;  %v1015_v38 = vsel %vm942_vm2, %v664_v30, %v691_v31 }
 0x159   : > { %1228 = vmatprep.subr.bf16.mxu0 %v1019_v37 }
 0x15a   : > { %v729_v44 = vpop.permute.xlu1 %728  ;;  %1229 = vmatpush1.bf16.msra.mxu0 %v1015_v38  ;;  %v3522_v46 = vpop.permute.xlu0 %838  ;;  %v935_v38 = vsel %vm933_vm15, %v3397_v55, %v3445_v4 }
 0x15b   : > { %v745_v33 = vsel %vm744_vm8, %v727_v12, %v729_v44  ;;  %v746_v63 = vsel %vm744_vm8, %v729_v44, %v3461_v9  ;;  %v772_v12 = vsel %vm771_vm9, %v3403_v56, %v3395_v54  ;;  %v827_v56 = vsel %vm825_vm11, %v3411_v58, %v3381_v51 }
 0x15c   : > { %927 = vrot.lane.b32.xlu1 %v3284_v34, %s5197_s26  ;;  %925 = vrot.lane.b32.xlu0 %v3250_v28, %s5197_s26  ;;  %v1055_v40 = vsel %vm942_vm2, %v719_v48, %v746_v63  ;;  %v1051_v41 = vsel %vm942_vm2, %v718_v61, %v745_v33  ;;  %v3616_v63 = vld [vmem:[%s5199_s3] sm:$0xf]  ;;  %s5216_s3 = smov 122  }
 0x15d   : > { %1230 = vmatprep.subr.bf16.mxu0 %v1055_v40 }
 0x15e   : > { %v783_v3 = vpop.permute.xlu1 %782  ;;  %1231 = vmatpush1.bf16.msra.mxu0 %v1051_v41  ;;  %v835_v7 = vpop.permute.xlu0 %834 }
 0x15f   : > { %v799_v13 = vsel %vm798_vm10, %v781_v27, %v783_v3  ;;  %v800_v14 = vsel %vm798_vm10, %v783_v3, %v3480_v17  ;;  %v880_v27 = vsel %vm879_vm13, %v3431_v0, %v3425_v62  ;;  %v934_v62 = vsel %vm933_vm15, %v3439_v2, %v3397_v55 }
 0x160   : > { %580 = vrot.lane.b32.xlu1 %v3543_v52, %s5148_s21  ;;  %578 = vrot.lane.b32.xlu0 %v3540_v50, %s5148_s21  ;;  %v1091_v15 = vsel %vm942_vm2, %v773_v10, %v800_v14  ;;  %v1087_v16 = vsel %vm942_vm2, %v772_v12, %v799_v13  ;;  %s5198_s21 = smov 126   ;;  %v1198_v55 = vsel %vm942_vm2, %v934_v62, 0  ;;  %v612_v10 = vsel %vm609_vm3, %v3349_v43, %v3405_v57 }
 0x161   : > { %1232 = vmatprep.subr.bf16.mxu0 %v1091_v15  ;;  %v615_v15 = vsel %vm609_vm3, %v3413_v59, %v3459_v8 }
 0x162   : > { %v837_v18 = vpop.permute.xlu1 %836  ;;  %1233 = vmatpush1.bf16.msra.mxu0 %v1087_v16  ;;  %v3560_v54 = vpop.permute.xlu0 %892 }
 0x163   : > { %v853_v20 = vsel %vm852_vm12, %v835_v7, %v837_v18  ;;  %v854_v21 = vsel %vm852_vm12, %v837_v18, %v3522_v46 }
 0x164   : > { %607 = vrot.lane.b32.xlu1 %v3520_v42, %s5198_s21  ;;  %605 = vrot.lane.b32.xlu0 %v3515_v39, %s5198_s21  ;;  %v1127_v23 = vsel %vm942_vm2, %v827_v56, %v854_v21  ;;  %v1123_v24 = vsel %vm942_vm2, %v826_v19, %v853_v20 }
 0x165   : > { %1234 = vmatprep.subr.bf16.mxu0 %v1127_v23 }
 0x166   : > { %v891_v58 = vpop.permute.xlu1 %890  ;;  %1235 = vmatpush1.bf16.msra.mxu0 %v1123_v24  ;;  %v889_v60 = vpop.permute.xlu0 %888 }
 0x167   : > { %v908_v29 = vsel %vm906_vm14, %v891_v58, %v3560_v54  ;;  %v907_v30 = vsel %vm906_vm14, %v889_v60, %v891_v58 }
 0x168   : > { %634 = vrot.lane.b32.xlu1 %v3543_v52, %s5150_s22  ;;  %632 = vrot.lane.b32.xlu0 %v3540_v50, %s5150_s22  ;;  %v1163_v31 = vsel %vm942_vm2, %v881_v25, %v908_v29  ;;  %v1159_v36 = vsel %vm942_vm2, %v880_v27, %v907_v30  ;;  %s5201_s22 = smov 115  }
 0x169   : > { %1236 = vmatprep.subr.bf16.mxu0 %v1163_v31 }
 0x16a   : > { %v573_v0 = vpop.permute.xlu1 %572  ;;  %1237 = vmatpush1.bf16.msra.mxu0 %v1159_v36  ;;  %v571_v37 = vpop.permute.xlu0 %570 }
 0x16b   : > { %2845 = vmatprep.subr.msk.bf16.mxu0 %vm942_vm2, %v935_v38  ;;  %v586_v44 = vsel %vm582_vm1, %v571_v37, %v573_v0  ;;  %v585_v48 = vsel %vm582_vm1, %v3468_v11, %v571_v37 }
 0x16c   : > { %661 = vrot.lane.b32.xlu1 %v3520_v42, %s5166_s27  ;;  %659 = vrot.lane.b32.xlu0 %v3515_v39, %s5166_s27  ;;  %v956_v2 = vsel %vm942_vm2, %v3243_v26, %v586_v44  ;;  %v952_v61 = vsel %vm942_vm2, %v3209_v22, %v585_v48 }
 0x16d   : > { %1265 = vmatprep.subr.bf16.mxu1 %v956_v2 }
 0x16e   : > { %v3611_v33 = vpop.permute.xlu1 %576  ;;  %1239 = vmatpush1.bf16.msra.mxu0 %v1198_v55  ;;  %1266 = vmatpush1.bf16.msra.mxu1 %v952_v61  ;;  %v575_v11 = vpop.permute.xlu0 %574 }
 0x16f   : > { %v587_v40 = vsel %vm582_vm1, %v573_v0, %v575_v11  ;;  %v588_v26 = vsel %vm582_vm1, %v575_v11, %v3611_v33 }
 0x170   : > { %688 = vrot.lane.b32.xlu1 %v3543_v52, %s5160_s23  ;;  %686 = vrot.lane.b32.xlu0 %v3540_v50, %s5160_s23  ;;  %v964_v22 = vsel %vm942_vm2, %v3250_v28, %v588_v26  ;;  %v960_v41 = vsel %vm942_vm2, %v3275_v32, %v587_v40  ;;  %v613_v28 = vsel %vm609_vm3, %v3405_v57, %v3453_v6  ;;  %s5204_s23 = smov 125  }
 0x171   : > { %1306 = vmatprep.subr.bf16.mxu0 %v964_v22  ;;  %2846 = vmatmul.mubr.msk.bf16.vlgmr.msra.gmra.mrb[0].mxu0 %vm771_vm9, %v3616_v63 }
 0x172   : > { %v627_v3 = vpop.permute.xlu1 %626  ;;  %1307 = vmatpush1.bf16.msra.mxu0 %v960_v41  ;;  %v625_v7 = vpop.permute.xlu0 %624  ;;  %1338 = vmatprep.mubr.bf16.mxu0 %v5170_v35 }
 0x173   : > { %v639_v32 = vsel %vm636_vm4, %v3433_v1, %v625_v7  ;;  %v640_v12 = vsel %vm636_vm4, %v625_v7, %v627_v3  ;;  %v614_v1 = vsel %vm609_vm3, %v3453_v6, %v3413_v59 }
 0x174   : > { %715 = vrot.lane.b32.xlu1 %v3520_v42, %s5168_s2  ;;  %713 = vrot.lane.b32.xlu0 %v3515_v39, %s5168_s2  ;;  %v991_v13 = vsel %vm942_vm2, %v613_v28, %v640_v12  ;;  %v987_v14 = vsel %vm942_vm2, %v612_v10, %v639_v32 }
 0x175   : > { %1267 = vmatprep.subr.bf16.mxu1 %v991_v13 }
 0x176   : > { %v3647_v43 = vpop.permute.xlu1 %630  ;;  %1268 = vmatpush1.bf16.msra.mxu1 %v987_v14  ;;  %v629_v57 = vpop.permute.xlu0 %628 }
 0x177   : > { %v641_v16 = vsel %vm636_vm4, %v627_v3, %v629_v57  ;;  %v642_v18 = vsel %vm636_vm4, %v629_v57, %v3647_v43 }
 0x178   : > { %742 = vrot.lane.b32.xlu1 %v3543_v52, %s5158_s24  ;;  %740 = vrot.lane.b32.xlu0 %v3540_v50, %s5158_s24  ;;  %v999_v56 = vsel %vm942_vm2, %v615_v15, %v642_v18  ;;  %v995_v19 = vsel %vm942_vm2, %v614_v1, %v641_v16  ;;  %s5205_s24 = smov 123  }
 0x179   : > { %1308 = vmatprep.subr.bf16.mxu0 %v999_v56 }
 0x17a   : > { %v654_v6 = vpop.permute.xlu1 %653  ;;  %1309 = vmatpush1.bf16.msra.mxu0 %v995_v19  ;;  %v652_v20 = vpop.permute.xlu0 %651 }
 0x17b   : > { %v666_v58 = vsel %vm663_vm5, %v3357_v45, %v652_v20  ;;  %v667_v60 = vsel %vm663_vm5, %v652_v20, %v654_v6 }
 0x17c   : > { %769 = vrot.lane.b32.xlu1 %v3520_v42, %s5164_s13  ;;  %767 = vrot.lane.b32.xlu0 %v3515_v39, %s5164_s13 }
 0x17e   : > { %v3668_v59 = vpop.permute.xlu1 %657  ;;  %v656_v21 = vpop.permute.xlu0 %655 }
 0x17f   : > { %v668_v36 = vsel %vm663_vm5, %v654_v6, %v656_v21 }
 0x180   : > { %796 = vrot.lane.b32.xlu1 %v3543_v52, %s5156_s0  ;;  %794 = vrot.lane.b32.xlu0 %v3540_v50, %s5156_s0  ;;  %s5206_s0 = smov 121  }
 0x182   : > { %v681_v23 = vpop.permute.xlu1 %680  ;;  %v679_v24 = vpop.permute.xlu0 %678 }
 0x183   : > { %v693_v25 = vsel %vm690_vm6, %v3447_v5, %v679_v24  ;;  %v694_v27 = vsel %vm690_vm6, %v679_v24, %v681_v23  ;;  %v669_v5 = vsel %vm663_vm5, %v656_v21, %v3668_v59 }
 0x184   : > { %823 = vrot.lane.b32.xlu1 %v3520_v42, %s5162_s14  ;;  %821 = vrot.lane.b32.xlu0 %v3515_v39, %s5162_s14  ;;  %v1027_v29 = vsel %vm942_vm2, %v667_v60, %v694_v27  ;;  %v1023_v30 = vsel %vm942_vm2, %v666_v58, %v693_v25 }
 0x185   : > { %1269 = vmatprep.subr.bf16.mxu1 %v1027_v29 }
 0x186   : > { %v3686_v31 = vpop.permute.xlu1 %684  ;;  %1270 = vmatpush1.bf16.msra.mxu1 %v1023_v30  ;;  %v683_v45 = vpop.permute.xlu0 %682 }
 0x187   : > { %v695_v62 = vsel %vm690_vm6, %v681_v23, %v683_v45  ;;  %v696_v0 = vsel %vm690_vm6, %v683_v45, %v3686_v31 }
 0x188   : > { %850 = vrot.lane.b32.xlu1 %v3543_v52, %s5154_s18  ;;  %848 = vrot.lane.b32.xlu0 %v3540_v50, %s5154_s18  ;;  %v1035_v37 = vsel %vm942_vm2, %v669_v5, %v696_v0  ;;  %v1031_v38 = vsel %vm942_vm2, %v668_v36, %v695_v62  ;;  %s5203_s18 = smov 127  }
 0x189   : > { %1310 = vmatprep.subr.bf16.mxu0 %v1035_v37 }
 0x18a   : > { %v708_v44 = vpop.permute.xlu1 %707  ;;  %1311 = vmatpush1.bf16.msra.mxu0 %v1031_v38  ;;  %v706_v48 = vpop.permute.xlu0 %705 }
 0x18b   : > { %v720_v40 = vsel %vm717_vm7, %v3365_v47, %v706_v48  ;;  %v721_v26 = vsel %vm717_vm7, %v706_v48, %v708_v44  ;;  %v1428_v47 = vld [vmem:[%s5136_s4] sm:$0xff] }
 0x18c   : > { %877 = vrot.lane.b32.xlu1 %v3520_v42, %s5200_s16  ;;  %875 = vrot.lane.b32.xlu0 %v3515_v39, %s5200_s16 }
 0x18e   : > { %v3704_v2 = vpop.permute.xlu1 %711  ;;  %v710_v61 = vpop.permute.xlu0 %709 }
 0x18f   : > { %v722_v10 = vsel %vm717_vm7, %v708_v44, %v710_v61  ;;  %v723_v28 = vsel %vm717_vm7, %v710_v61, %v3704_v2 }
 0x190   : > { %904 = vrot.lane.b32.xlu1 %v3543_v52, %s5201_s22  ;;  %902 = vrot.lane.b32.xlu0 %v3540_v50, %s5201_s22 }
 0x192   : > { %v735_v55 = vpop.permute.xlu1 %734  ;;  %v733_v11 = vpop.permute.xlu0 %732 }
 0x193   : > { %v747_v22 = vsel %vm744_vm8, %v3461_v9, %v733_v11  ;;  %v748_v41 = vsel %vm744_vm8, %v733_v11, %v735_v55  ;;  %v1443_v9 = vld [vmem:[%s5137_s5] sm:$0xff] }
 0x194   : > { %931 = vrot.lane.b32.xlu1 %v3520_v42, %s5197_s26  ;;  %929 = vrot.lane.b32.xlu0 %v3515_v39, %s5197_s26  ;;  %v1063_v50 = vsel %vm942_vm2, %v721_v26, %v748_v41  ;;  %v1059_v52 = vsel %vm942_vm2, %v720_v40, %v747_v22 }
 0x195   : > { %1271 = vmatprep.subr.bf16.mxu1 %v1063_v50 }
 0x196   : > { %v3728_v3 = vpop.permute.xlu1 %738  ;;  %1272 = vmatpush1.bf16.msra.mxu1 %v1059_v52  ;;  %v737_v7 = vpop.permute.xlu0 %736 }
 0x197   : > { %v749_v32 = vsel %vm744_vm8, %v735_v55, %v737_v7  ;;  %v750_v12 = vsel %vm744_vm8, %v737_v7, %v3728_v3 }
 0x198   : > { %v1071_v13 = vsel %vm942_vm2, %v723_v28, %v750_v12  ;;  %v1067_v14 = vsel %vm942_vm2, %v722_v10, %v749_v32  ;;  %1431 = vperm.xlu0 %2975, %v1428_v47   ;;  %1446 = vperm.xlu1 %2976, %v1443_v9  }
 0x199   : > { %1312 = vmatprep.subr.bf16.mxu0 %v1071_v13 }
 0x19a   : > { %v762_v57 = vpop.permute.xlu1 %761  ;;  %1313 = vmatpush1.bf16.msra.mxu0 %v1067_v14  ;;  %v760_v1 = vpop.permute.xlu0 %759 }
 0x19b   : > { %v774_v19 = vsel %vm771_vm9, %v3373_v49, %v760_v1  ;;  %v775_v6 = vsel %vm771_vm9, %v760_v1, %v762_v57 }
 0x19e   : > { %v3738_v15 = vpop.permute.xlu1 %765  ;;  %v764_v16 = vpop.permute.xlu0 %763 }
 0x19f   : > { %v776_v25 = vsel %vm771_vm9, %v762_v57, %v764_v16  ;;  %v777_v49 = vsel %vm771_vm9, %v764_v16, %v3738_v15 }
 0x1a2   : > { %v789_v18 = vpop.permute.xlu1 %788  ;;  %v787_v56 = vpop.permute.xlu0 %786 }
 0x1a3   : > { %v801_v20 = vsel %vm798_vm10, %v3480_v17, %v787_v56  ;;  %v802_v21 = vsel %vm798_vm10, %v787_v56, %v789_v18 }
 0x1a4   : > { %v1099_v23 = vsel %vm942_vm2, %v775_v6, %v802_v21  ;;  %v1095_v24 = vsel %vm942_vm2, %v774_v19, %v801_v20 }
 0x1a5   : > { %1273 = vmatprep.subr.bf16.mxu1 %v1099_v23 }
 0x1a6   : > { %v3748_v58 = vpop.permute.xlu1 %792  ;;  %1274 = vmatpush1.bf16.msra.mxu1 %v1095_v24  ;;  %v791_v60 = vpop.permute.xlu0 %790 }
 0x1a7   : > { %v803_v27 = vsel %vm798_vm10, %v789_v18, %v791_v60  ;;  %v804_v17 = vsel %vm798_vm10, %v791_v60, %v3748_v58 }
 0x1a8   : > { %v1107_v29 = vsel %vm942_vm2, %v777_v49, %v804_v17  ;;  %v1103_v30 = vsel %vm942_vm2, %v776_v25, %v803_v27 }
 0x1a9   : > { %1314 = vmatprep.subr.bf16.mxu0 %v1107_v29 }
 0x1aa   : > { %v816_v45 = vpop.permute.xlu1 %815  ;;  %1315 = vmatpush1.bf16.msra.mxu0 %v1103_v30  ;;  %v814_v36 = vpop.permute.xlu0 %813 }
 0x1ab   : > { %v828_v38 = vsel %vm825_vm11, %v3381_v51, %v814_v36  ;;  %v829_v44 = vsel %vm825_vm11, %v814_v36, %v816_v45 }
 0x1ae   : > { %v3758_v5 = vpop.permute.xlu1 %819  ;;  %v818_v62 = vpop.permute.xlu0 %817 }
 0x1af   : > { %v830_v22 = vsel %vm825_vm11, %v816_v45, %v818_v62  ;;  %v831_v51 = vsel %vm825_vm11, %v818_v62, %v3758_v5  ;;  %v3082_v62 = vmov 0.0  }
 0x1b2   : > { %v843_v0 = vpop.permute.xlu1 %842  ;;  %v841_v37 = vpop.permute.xlu0 %840 }
 0x1b3   : > { %v855_v48 = vsel %vm852_vm12, %v3522_v46, %v841_v37  ;;  %v856_v61 = vsel %vm852_vm12, %v841_v37, %v843_v0 }
 0x1b4   : > { %v1135_v55 = vsel %vm942_vm2, %v829_v44, %v856_v61  ;;  %v1131_v11 = vsel %vm942_vm2, %v828_v38, %v855_v48 }
 0x1b5   : > { %1275 = vmatprep.subr.bf16.mxu1 %v1135_v55 }
 0x1b6   : > { %v3768_v40 = vpop.permute.xlu1 %846  ;;  %1276 = vmatpush1.bf16.msra.mxu1 %v1131_v11  ;;  %v845_v26 = vpop.permute.xlu0 %844 }
 0x1b7   : > { %v857_v41 = vsel %vm852_vm12, %v843_v0, %v845_v26  ;;  %v858_v46 = vsel %vm852_vm12, %v845_v26, %v3768_v40 }
 0x1b8   : > { %v1143_v50 = vsel %vm942_vm2, %v831_v51, %v858_v46  ;;  %v1139_v52 = vsel %vm942_vm2, %v830_v22, %v857_v41 }
 0x1b9   : > { %1316 = vmatprep.subr.bf16.mxu0 %v1143_v50 }
 0x1ba   : > { %v870_v47 = vpop.permute.xlu1 %869  ;;  %1317 = vmatpush1.bf16.msra.mxu0 %v1139_v52  ;;  %v868_v9 = vpop.permute.xlu0 %867 }
 0x1bb   : > { %v882_v12 = vsel %vm879_vm13, %v3389_v53, %v868_v9  ;;  %v883_v13 = vsel %vm879_vm13, %v868_v9, %v870_v47 }
 0x1be   : > { %v3778_v7 = vpop.permute.xlu1 %873  ;;  %v872_v10 = vpop.permute.xlu0 %871 }
 0x1bf   : > { %v884_v19 = vsel %vm879_vm13, %v870_v47, %v872_v10  ;;  %v885_v53 = vsel %vm879_vm13, %v872_v10, %v3778_v7 }
 0x1c2   : > { %v897_v28 = vpop.permute.xlu1 %896  ;;  %v895_v32 = vpop.permute.xlu0 %894 }
 0x1c3   : > { %v909_v14 = vsel %vm906_vm14, %v3560_v54, %v895_v32  ;;  %v910_v57 = vsel %vm906_vm14, %v895_v32, %v897_v28 }
 0x1c4   : > { %v1171_v1 = vsel %vm942_vm2, %v883_v13, %v910_v57  ;;  %v1167_v16 = vsel %vm942_vm2, %v882_v12, %v909_v14 }
 0x1c5   : > { %1277 = vmatprep.subr.bf16.mxu1 %v1171_v1 }
 0x1c6   : > { %v3788_v18 = vpop.permute.xlu1 %900  ;;  %1278 = vmatpush1.bf16.msra.mxu1 %v1167_v16  ;;  %v899_v56 = vpop.permute.xlu0 %898 }
 0x1c7   : > { %v911_v6 = vsel %vm906_vm14, %v897_v28, %v899_v56  ;;  %v912_v54 = vsel %vm906_vm14, %v899_v56, %v3788_v18 }
 0x1c8   : > { %v1179_v20 = vsel %vm942_vm2, %v885_v53, %v912_v54  ;;  %v1175_v21 = vsel %vm942_vm2, %v884_v19, %v911_v6 }
 0x1c9   : > { %1318 = vmatprep.subr.bf16.mxu0 %v1179_v20 }
 0x1ca   : > { %v924_v23 = vpop.permute.xlu1 %923  ;;  %1319 = vmatpush1.bf16.msra.mxu0 %v1175_v21  ;;  %v922_v24 = vpop.permute.xlu0 %921 }
 0x1cb   : > { %v937_v60 = vsel %vm933_vm15, %v922_v24, %v924_v23  ;;  %v936_v25 = vsel %vm933_vm15, %v3445_v4, %v922_v24 }
 0x1cc   : > { %2847 = vmatprep.subr.msk.bf16.mxu1 %vm942_vm2, %v937_v60  ;;  %v1204_v49 = vsel %vm942_vm2, %v936_v25, 0 }
 0x1cd   : > { %1280 = vmatpush1.bf16.msra.mxu1 %v1204_v49 }
 0x1ce   : > { %v3803_v27 = vpop.permute.xlu1 %927  ;;  %v926_v17 = vpop.permute.xlu0 %925 }
 0x1cf   : > { %v938_v29 = vsel %vm933_vm15, %v924_v23, %v926_v17  ;;  %v939_v30 = vsel %vm933_vm15, %v926_v17, %v3803_v27 }
 0x1d0   : > { %2848 = vmatmul.mubr.msk.bf16.vlgmr.msra.gmra.mrb[0].mxu1 %vm771_vm9, %v3616_v63  ;;  %2849 = vmatprep.subr.msk.bf16.mxu0 %vm942_vm2, %v939_v30  ;;  %v1210_v4 = vsel %vm942_vm2, %v938_v29, 0 }
 0x1d1   : > { %1321 = vmatpush1.bf16.msra.mxu0 %v1210_v4  ;;  %1379 = vmatprep.mubr.bf16.mxu1 %v5170_v35 }
 0x1d2   : > { %v581_v45 = vpop.permute.xlu1 %580  ;;  %v579_v36 = vpop.permute.xlu0 %578  ;;  %2881 = vmatprep.subr.bf16.mxu0 %v3082_v62 }
 0x1d3   : > { %v589_v0 = vsel %vm582_vm1, %v3611_v33, %v579_v36  ;;  %v590_v37 = vsel %vm582_vm1, %v579_v36, %v581_v45  ;;  %v975_v38 = vsel %vm942_vm2, %v3520_v42, %v581_v45 }
 0x1d4   : > { %2850 = vmatmul.mubr.msk.bf16.vlgmr.msra.gmra.mrb[4].mxu0 %vm771_vm9, %v3616_v63  ;;  %v972_v44 = vsel %vm942_vm2, %v3515_v39, %v590_v37  ;;  %v968_v48 = vsel %vm942_vm2, %v3284_v34, %v589_v0 }
 0x1d5   : > { %1347 = vmatprep.subr.bf16.mxu1 %v972_v44  ;;  %2882 = vmatpush3.bf16.msra.mxu0 %v975_v38 }
 0x1d6   : > { %v608_v61 = vpop.permute.xlu1 %607  ;;  %1348 = vmatpush1.bf16.msra.mxu1 %v968_v48  ;;  %v606_v55 = vpop.permute.xlu0 %605  ;;  %2883 = vmatprep.subr.bf16.mxu0 %v3082_v62 }
 0x1d7   : > { %2897 = vmatprep.mubr.msk.bf16.mxu0 %vm3083_vm0, %v3082_v62  ;;  %v616_v42 = vsel %vm609_vm3, %v3459_v8, %v606_v55  ;;  %v617_v39 = vsel %vm609_vm3, %v606_v55, %v608_v61 }
 0x1da   : > { %v635_v33 = vpop.permute.xlu1 %634  ;;  %v633_v11 = vpop.permute.xlu0 %632 }
 0x1db   : > { %v643_v34 = vsel %vm636_vm4, %v3647_v43, %v633_v11  ;;  %v644_v26 = vsel %vm636_vm4, %v633_v11, %v635_v33  ;;  %v1011_v22 = vsel %vm942_vm2, %v608_v61, %v635_v33 }
 0x1dc   : > { %2884 = vmatpush3.bf16.msra.mxu0 %v1011_v22  ;;  %v1007_v51 = vsel %vm942_vm2, %v617_v39, %v644_v26  ;;  %v1003_v41 = vsel %vm942_vm2, %v616_v42, %v643_v34 }
 0x1dd   : > { %1349 = vmatprep.subr.bf16.mxu1 %v1007_v51  ;;  %2885 = vmatprep.subr.bf16.mxu0 %v3082_v62 }
 0x1de   : > { %v662_v8 = vpop.permute.xlu1 %661  ;;  %1350 = vmatpush1.bf16.msra.mxu1 %v1003_v41  ;;  %v660_v46 = vpop.permute.xlu0 %659 }
 0x1df   : > { %v670_v50 = vsel %vm663_vm5, %v3668_v59, %v660_v46  ;;  %v671_v47 = vsel %vm663_vm5, %v660_v46, %v662_v8 }
 0x1e2   : > { %v689_v52 = vpop.permute.xlu1 %688  ;;  %v687_v43 = vpop.permute.xlu0 %686 }
 0x1e3   : > { %v697_v9 = vsel %vm690_vm6, %v3686_v31, %v687_v43  ;;  %v698_v10 = vsel %vm690_vm6, %v687_v43, %v689_v52  ;;  %v1047_v28 = vsel %vm942_vm2, %v662_v8, %v689_v52 }
 0x1e4   : > { %2886 = vmatpush3.bf16.msra.mxu0 %v1047_v28  ;;  %v1043_v32 = vsel %vm942_vm2, %v671_v47, %v698_v10  ;;  %v1039_v12 = vsel %vm942_vm2, %v670_v50, %v697_v9 }
 0x1e5   : > { %1351 = vmatprep.subr.bf16.mxu1 %v1043_v32  ;;  %2887 = vmatprep.subr.bf16.mxu0 %v3082_v62 }
 0x1e6   : > { %v716_v59 = vpop.permute.xlu1 %715  ;;  %1352 = vmatpush1.bf16.msra.mxu1 %v1039_v12  ;;  %v714_v13 = vpop.permute.xlu0 %713 }
 0x1e7   : > { %v724_v14 = vsel %vm717_vm7, %v3704_v2, %v714_v13  ;;  %v725_v1 = vsel %vm717_vm7, %v714_v13, %v716_v59 }
 0x1ea   : > { %v743_v57 = vpop.permute.xlu1 %742  ;;  %v741_v31 = vpop.permute.xlu0 %740 }
 0x1eb   : > { %v751_v16 = vsel %vm744_vm8, %v3728_v3, %v741_v31  ;;  %v752_v56 = vsel %vm744_vm8, %v741_v31, %v743_v57  ;;  %v1083_v19 = vsel %vm942_vm2, %v716_v59, %v743_v57  ;;  %v1467_v31 = vlaneseq }
 0x1ec   : > { %2888 = vmatpush3.bf16.msra.mxu0 %v1083_v19  ;;  %v1079_v53 = vsel %vm942_vm2, %v725_v1, %v752_v56  ;;  %v1075_v6 = vsel %vm942_vm2, %v724_v14, %v751_v16 }
 0x1ed   : > { %1353 = vmatprep.subr.bf16.mxu1 %v1079_v53  ;;  %2889 = vmatprep.subr.bf16.mxu0 %v3082_v62 }
 0x1ee   : > { %v770_v2 = vpop.permute.xlu1 %769  ;;  %1354 = vmatpush1.bf16.msra.mxu1 %v1075_v6  ;;  %v768_v54 = vpop.permute.xlu0 %767 }
 0x1ef   : > { %v778_v20 = vsel %vm771_vm9, %v3738_v15, %v768_v54  ;;  %v779_v23 = vsel %vm771_vm9, %v768_v54, %v770_v2 }
 0x1f2   : > { %v797_v21 = vpop.permute.xlu1 %796  ;;  %v795_v3 = vpop.permute.xlu0 %794 }
 0x1f3   : > { %v805_v24 = vsel %vm798_vm10, %v3748_v58, %v795_v3  ;;  %v806_v60 = vsel %vm798_vm10, %v795_v3, %v797_v21  ;;  %v1119_v25 = vsel %vm942_vm2, %v770_v2, %v797_v21 }
 0x1f4   : > { %2890 = vmatpush3.bf16.msra.mxu0 %v1119_v25  ;;  %v1115_v49 = vsel %vm942_vm2, %v779_v23, %v806_v60  ;;  %v1111_v17 = vsel %vm942_vm2, %v778_v20, %v805_v24  ;;  %v1468_v20 = vand.u32 127, %v1467_v31 }
 0x1f5   : > { %1355 = vmatprep.subr.bf16.mxu1 %v1115_v49  ;;  %2891 = vmatprep.subr.bf16.mxu0 %v3082_v62 }
 0x1f6   : > { %v824_v15 = vpop.permute.xlu1 %823  ;;  %1356 = vmatpush1.bf16.msra.mxu1 %v1111_v17  ;;  %v822_v29 = vpop.permute.xlu0 %821  ;;  %vm1478_vm0 = vcmp.ge.s32.totalorder %v1468_v20, 8 }
 0x1f7   : > { %v832_v30 = vsel %vm825_vm11, %v3758_v5, %v822_v29  ;;  %v833_v45 = vsel %vm825_vm11, %v822_v29, %v824_v15 }
 0x1fa   : > { %v851_v4 = vpop.permute.xlu1 %850  ;;  %v849_v58 = vpop.permute.xlu0 %848 }
 0x1fb   : > { %v859_v36 = vsel %vm852_vm12, %v3768_v40, %v849_v58  ;;  %v860_v0 = vsel %vm852_vm12, %v849_v58, %v851_v4  ;;  %v1155_v37 = vsel %vm942_vm2, %v824_v15, %v851_v4  ;;  %v1476_v4 = vadd.s32 1024, %v1468_v20 }
 0x1fc   : > { %2892 = vmatpush3.bf16.msra.mxu0 %v1155_v37  ;;  %v1151_v38 = vsel %vm942_vm2, %v833_v45, %v860_v0  ;;  %v1147_v44 = vsel %vm942_vm2, %v832_v30, %v859_v36 }
 0x1fd   : > { %1357 = vmatprep.subr.bf16.mxu1 %v1151_v38  ;;  %2893 = vmatprep.subr.bf16.mxu0 %v3082_v62 }
 0x1fe   : > { %v878_v5 = vpop.permute.xlu1 %877  ;;  %1358 = vmatpush1.bf16.msra.mxu1 %v1147_v44  ;;  %v876_v48 = vpop.permute.xlu0 %875 }
 0x1ff   : > { %v886_v61 = vsel %vm879_vm13, %v3778_v7, %v876_v48  ;;  %v887_v42 = vsel %vm879_vm13, %v876_v48, %v878_v5 }
 0x202   : > { %v905_v55 = vpop.permute.xlu1 %904  ;;  %v903_v40 = vpop.permute.xlu0 %902 }
 0x203   : > { %v913_v33 = vsel %vm906_vm14, %v3788_v18, %v903_v40  ;;  %v914_v11 = vsel %vm906_vm14, %v903_v40, %v905_v55  ;;  %v1191_v39 = vsel %vm942_vm2, %v878_v5, %v905_v55 }
 0x204   : > { %2894 = vmatpush3.bf16.msra.mxu0 %v1191_v39  ;;  %v1187_v34 = vsel %vm942_vm2, %v887_v42, %v914_v11  ;;  %v1183_v26 = vsel %vm942_vm2, %v886_v61, %v913_v33 }
 0x205   : > { %1359 = vmatprep.subr.bf16.mxu1 %v1187_v34  ;;  %2895 = vmatprep.subr.bf16.mxu0 %v3082_v62 }
 0x206   : > { %v932_v7 = vpop.permute.xlu1 %931  ;;  %1360 = vmatpush1.bf16.msra.mxu1 %v1183_v26  ;;  %v930_v22 = vpop.permute.xlu0 %929 }
 0x207   : > { %v940_v51 = vsel %vm933_vm15, %v3803_v27, %v930_v22  ;;  %v941_v18 = vsel %vm933_vm15, %v930_v22, %v932_v7  ;;  %v1222_v41 = vsel %vm942_vm2, %v932_v7, 0 }
 0x208   : > { %2851 = vmatprep.subr.msk.bf16.mxu1 %vm942_vm2, %v941_v18  ;;  %2896 = vmatpush3.bf16.msra.mxu0 %v1222_v41  ;;  %v1216_v8 = vsel %vm942_vm2, %v940_v51, 0 }
 0x20a   : > { %1362 = vmatpush1.bf16.msra.mxu1 %v1216_v8 }
 0x20b   : > { %2898 = vmatmul.mubr.msk.bf16.vlgmr.msra.gmra.mrb[8].mxu0 %vm771_vm9, %v3616_v63 }
 0x20c   : > { %2561 = vmatprep.mubr.bf16.mxu0 %v5170_v35 }
 0x20d   : > { %2852 = vmatmul.mubr.msk.bf16.vlgmr.msra.gmra.mrb[4].mxu1 %vm771_vm9, %v3616_v63 }
 0x20e   : > { %2520 = vmatprep.mubr.bf16.mxu1 %v5170_v35 }
 0x217   : > { %v3899_v52 = vpop.permute.xlu0 %1431  ;;  %v3902_v9 = vpop.permute.xlu1 %1446 }
 0x244   : > { %v1258_v27 = vpop.f32.mrb[0].mxu0 }
 0x245   : > { %v1260_v62 = vpop.f32.mrb[1].mxu0  ;;  %v1434_v14 = vmul.f32 %v3899_v52, %v1258_v27 }
 0x246   : > { %v1262_v46 = vpop.f32.mrb[2].mxu0  ;;  %v1435_v43 = vmul.f32 %v3899_v52, %v1260_v62 }
 0x247   : > { %v1263_v50 = vpop.f32.mrb[3].mxu0  ;;  %v1449_v54 = vadd.f32 %v3902_v9, %v1434_v14 }
 0x248   : > { %v1450_v63 = vadd.f32 %v3902_v9, %v1435_v43 }
 0x249   : > { %v1458_v23 = vmax.f32 %v1449_v54, 0.0 }
 0x24a   : > { %v1459_v53 = vmax.f32 %v1450_v63, 0.0 }
 0x24b   : > { %v1544_v60 = vsel %vm1478_vm0, %v1458_v23, 0.0  ;;  %vm1507_vm0 = vcmp.lt.s32.totalorder %v1476_v4, 1032 }
 0x24c   : > { %v3921_v3 = vpack.c.bf16 %v1459_v53, %v1459_v53  ;;  %v3933_v25 = vpack.c.bf16 %v1544_v60, %v1544_v60 }
 0x24e   : > { %v1572_v17 = vrot.slane %v3933_v25, 4  ;;  %v1573_v15 = vrot.slane %v3921_v3, 4 }
 0x2a3   : > { %v1299_v47 = vpop.f32.mrb[0].mxu1 }
 0x2a4   : > { %v1436_v10 = vmul.f32 %v3899_v52, %v1299_v47  ;;  %v1301_v28 = vpop.f32.mrb[1].mxu1 }
 0x2a5   : > { %v1303_v32 = vpop.f32.mrb[2].mxu1  ;;  %v1437_v12 = vmul.f32 %v3899_v52, %v1301_v28 }
 0x2a6   : > { %v1451_v59 = vadd.f32 %v3902_v9, %v1436_v10  ;;  %v1304_v13 = vpop.f32.mrb[3].mxu1 }
 0x2a7   : > { %v3909_v57 = vpop.f32.mrb[4].mxu0  ;;  %v1452_v19 = vadd.f32 %v3902_v9, %v1437_v12 }
 0x2a8   : > { %v1460_v1 = vmax.f32 %v1451_v59, 0.0  ;;  %v3911_v16 = vpop.f32.mrb[5].mxu0  ;;  %v1438_v40 = vmul.f32 %v3899_v52, %v3909_v57 }
 0x2a9   : > { %v1344_v56 = vpop.f32.mrb[6].mxu0  ;;  %v1461_v21 = vmax.f32 %v1452_v19, 0.0  ;;  %v1439_v33 = vmul.f32 %v3899_v52, %v3911_v16 }
 0x2aa   : > { %v3914_v6 = vpack.c.bf16 %v1460_v1, %v1460_v1  ;;  %v1345_v2 = vpop.f32.mrb[7].mxu0  ;;  %v1453_v42 = vadd.f32 %v3902_v9, %v1438_v40 }
 0x2ab   : > { %v3927_v24 = vpack.c.bf16 %v1461_v21, %v1461_v21  ;;  %v1454_v39 = vadd.f32 %v3902_v9, %v1439_v33 }
 0x2ac   : > { %1923 = vrot.lane.b32.xlu1 %v3914_v6, %s5197_s26  ;;  %1611 = vrot.lane.b32.xlu0 %v3914_v6, %s5198_s21  ;;  %v1574_v49 = vrot.slane %v3914_v6, 4  ;;  %v1462_v11 = vmax.f32 %v1453_v42, 0.0 }
 0x2ad   : > { %5202 = vst [vmem:[#allocation5_spill] sm:$0xff] %v3927_v24  ;;  %v1575_v29 = vrot.slane %v3927_v24, 4  ;;  %v1463_v26 = vmax.f32 %v1454_v39, 0.0 }
 0x2ae   : > { %v4021_v34 = vpack.c.bf16 %v1462_v11, %v1462_v11 }
 0x2af   : > { %v4027_v7 = vpack.c.bf16 %v1463_v26, %v1463_v26 }
 0x2b0   : > { %1663 = vrot.lane.b32.xlu0 %v3914_v6, %s5166_s27  ;;  %1609 = vrot.lane.b32.xlu1 %v3921_v3, %s5198_s21  ;;  %5209 = vst [vmem:[#allocation6_spill] sm:$0xff] %v4021_v34 }
 0x2b1   : > { %5210 = vst [vmem:[#allocation7_spill] sm:$0xff] %v4027_v7  ;;  %v1577_v4 = vrot.slane %v4027_v7, 4 }
 0x2b4   : > { %1715 = vrot.lane.b32.xlu0 %v3914_v6, %s5168_s2  ;;  %1613 = vrot.lane.b32.xlu1 %v3927_v24, %s5198_s21 }
 0x2b8   : > { %1767 = vrot.lane.b32.xlu0 %v3914_v6, %s5164_s13  ;;  %1607 = vrot.lane.b32.xlu1 %v3933_v25, %s5198_s21 }
 0x2bc   : > { %1819 = vrot.lane.b32.xlu0 %v3914_v6, %s5162_s14  ;;  %1661 = vrot.lane.b32.xlu1 %v3921_v3, %s5166_s27 }
 0x2c0   : > { %1871 = vrot.lane.b32.xlu0 %v3914_v6, %s5200_s16  ;;  %1665 = vrot.lane.b32.xlu1 %v3927_v24, %s5166_s27 }
 0x2c4   : > { %1921 = vrot.lane.b32.xlu0 %v3921_v3, %s5197_s26  ;;  %1659 = vrot.lane.b32.xlu1 %v3933_v25, %s5166_s27 }
 0x2c8   : > { %1925 = vrot.lane.b32.xlu0 %v3927_v24, %s5197_s26  ;;  %1713 = vrot.lane.b32.xlu1 %v3921_v3, %s5168_s2 }
 0x2cc   : > { %1585 = vrot.lane.b32.xlu0 %v1574_v49, %s5203_s18  ;;  %1717 = vrot.lane.b32.xlu1 %v3927_v24, %s5168_s2 }
 0x2d0   : > { %1711 = vrot.lane.b32.xlu1 %v3933_v25, %s5168_s2  ;;  %1581 = vrot.lane.b32.xlu0 %v1572_v17, %s5203_s18 }
 0x2d4   : > { %1765 = vrot.lane.b32.xlu1 %v3921_v3, %s5164_s13  ;;  %1635 = vrot.lane.b32.xlu0 %v1573_v15, %s5204_s23 }
 0x2d8   : > { %1769 = vrot.lane.b32.xlu1 %v3927_v24, %s5164_s13  ;;  %1639 = vrot.lane.b32.xlu0 %v1575_v29, %s5204_s23 }
 0x2dc   : > { %1763 = vrot.lane.b32.xlu1 %v3933_v25, %s5164_s13  ;;  %1633 = vrot.lane.b32.xlu0 %v1572_v17, %s5204_s23  ;;  %s5208_s13 = smov 117  }
 0x2de   : > { %v1422_v30 = vpop.f32.mrb[8].mxu0 }
 0x2df   : > { %v1442_v58 = vmul.f32 %v3899_v52, %v1422_v30  ;;  %v2899_v45 = vpop.f32.mrb[9].mxu0 }
 0x2e0   : > { %v1381_v36 = vpop.f32.mrb[4].mxu1  ;;  %1817 = vrot.lane.b32.xlu1 %v3921_v3, %s5162_s14  ;;  %1687 = vrot.lane.b32.xlu0 %v1573_v15, %s5205_s24  ;;  %v1425_v0 = vpop.f32.mrb[10].mxu0 }
 0x2e1   : > { %v1457_v37 = vadd.f32 %v3902_v9, %v1442_v58  ;;  %v1383_v38 = vpop.f32.mrb[5].mxu1  ;;  %v2900_v44 = vpop.f32.mrb[11].mxu0  ;;  %v1440_v8 = vmul.f32 %v3899_v52, %v1381_v36 }
 0x2e2   : > { %v1385_v5 = vpop.f32.mrb[6].mxu1  ;;  %v1441_v50 = vmul.f32 %v3899_v52, %v1383_v38 }
 0x2e3   : > { %v1466_v48 = vmax.f32 %v1457_v37, 0.0  ;;  %v1386_v61 = vpop.f32.mrb[7].mxu1  ;;  %v1455_v46 = vadd.f32 %v3902_v9, %v1440_v8 }
 0x2e4   : > { %1821 = vrot.lane.b32.xlu1 %v3927_v24, %s5162_s14  ;;  %1691 = vrot.lane.b32.xlu0 %v1575_v29, %s5205_s24  ;;  %v1456_v28 = vadd.f32 %v3902_v9, %v1441_v50 }
 0x2e5   : > { %v3982_v55 = vsel %vm1507_vm0, %v1466_v48, 0.0  ;;  %v1464_v10 = vmax.f32 %v1455_v46, 0.0 }
 0x2e6   : > { %v1465_v63 = vmax.f32 %v1456_v28, 0.0 }
 0x2e7   : > { %v4073_v52 = vpack.c.bf16 %v1464_v10, %v1464_v10 }
 0x2e8   : > { %1815 = vrot.lane.b32.xlu1 %v3933_v25, %s5162_s14  ;;  %1685 = vrot.lane.b32.xlu0 %v1572_v17, %s5205_s24  ;;  %s5207_s14 = smov 119   ;;  %v4083_v9 = vpack.c.bf16 %v1465_v63, %v1465_v63 }
 0x2e9   : > { %5213 = vst [vmem:[#allocation8_spill] sm:$0xff] %v4073_v52  ;;  %v1578_v40 = vrot.slane %v4073_v52, 4 }
 0x2ea   : > { %5214 = vst [vmem:[#allocation9_spill] sm:$0xff] %v4083_v9  ;;  %v1579_v11 = vrot.slane %v4083_v9, 4 }
 0x2ec   : > { %1869 = vrot.lane.b32.xlu1 %v3921_v3, %s5200_s16  ;;  %1739 = vrot.lane.b32.xlu0 %v1573_v15, %s5206_s0 }
 0x2f0   : > { %1873 = vrot.lane.b32.xlu1 %v3927_v24, %s5200_s16  ;;  %1743 = vrot.lane.b32.xlu0 %v1575_v29, %s5206_s0 }
 0x2f4   : > { %1867 = vrot.lane.b32.xlu1 %v3933_v25, %s5200_s16  ;;  %1737 = vrot.lane.b32.xlu0 %v1572_v17, %s5206_s0 }
 0x2f8   : > { %1919 = vrot.lane.b32.xlu1 %v3933_v25, %s5197_s26  ;;  %1791 = vrot.lane.b32.xlu0 %v1573_v15, %s5207_s14 }
 0x2fc   : > { %1637 = vrot.lane.b32.xlu1 %v1574_v49, %s5204_s23  ;;  %1795 = vrot.lane.b32.xlu0 %v1575_v29, %s5207_s14 }
 0x300   : > { %1689 = vrot.lane.b32.xlu1 %v1574_v49, %s5205_s24  ;;  %1789 = vrot.lane.b32.xlu0 %v1572_v17, %s5207_s14 }
 0x304   : > { %1741 = vrot.lane.b32.xlu1 %v1574_v49, %s5206_s0  ;;  %1843 = vrot.lane.b32.xlu0 %v1573_v15, %s5208_s13 }
 0x308   : > { %1793 = vrot.lane.b32.xlu1 %v1574_v49, %s5207_s14  ;;  %1847 = vrot.lane.b32.xlu0 %v1575_v29, %s5208_s13 }
 0x30c   : > { %1845 = vrot.lane.b32.xlu1 %v1574_v49, %s5208_s13  ;;  %1841 = vrot.lane.b32.xlu0 %v1572_v17, %s5208_s13 }
 0x310   : > { %1897 = vrot.lane.b32.xlu1 %v1574_v49, %s5201_s22  ;;  %1895 = vrot.lane.b32.xlu0 %v1573_v15, %s5201_s22 }
 0x314   : > { %1583 = vrot.lane.b32.xlu1 %v1573_v15, %s5203_s18  ;;  %1899 = vrot.lane.b32.xlu0 %v1575_v29, %s5201_s22  ;;  %v1576_v15 = vrot.slane %v4021_v34, 4 }
 0x318   : > { %1587 = vrot.lane.b32.xlu1 %v1575_v29, %s5203_s18  ;;  %1893 = vrot.lane.b32.xlu0 %v1572_v17, %s5201_s22 }
 0x31c   : > { %1927 = vrot.lane.b32.xlu1 %v4021_v34, %s5197_s26  ;;  %1615 = vrot.lane.b32.xlu0 %v4021_v34, %s5198_s21 }
 0x31e   : > { %v4029_v22 = vpop.permute.xlu1 %1923  ;;  %v4031_v51 = vpop.permute.xlu0 %1611 }
 0x320   : > { %1617 = vrot.lane.b32.xlu1 %v4027_v7, %s5198_s21  ;;  %1667 = vrot.lane.b32.xlu0 %v4021_v34, %s5166_s27 }
 0x322   : > { %v4037_v18 = vpop.permute.xlu0 %1663  ;;  %v4039_v41 = vpop.permute.xlu1 %1609 }
 0x324   : > { %1669 = vrot.lane.b32.xlu1 %v4027_v7, %s5166_s27  ;;  %1719 = vrot.lane.b32.xlu0 %v4021_v34, %s5168_s2  ;;  %s5212_s27 = smov 118  }
 0x326   : > { %v4046_v27 = vpop.permute.xlu0 %1715  ;;  %v4048_v62 = vpop.permute.xlu1 %1613 }
 0x328   : > { %1721 = vrot.lane.b32.xlu1 %v4027_v7, %s5168_s2  ;;  %1771 = vrot.lane.b32.xlu0 %v4021_v34, %s5211_s1  ;;  %s5215_s2 = smov 124  }
 0x32a   : > { %v4056_v43 = vpop.permute.xlu0 %1767  ;;  %v4058_v47 = vpop.permute.xlu1 %1607 }
 0x32c   : > { %1773 = vrot.lane.b32.xlu1 %v4027_v7, %s5211_s1  ;;  %1823 = vrot.lane.b32.xlu0 %v4021_v34, %s5212_s27 }
 0x32e   : > { %v4065_v32 = vpop.permute.xlu0 %1819  ;;  %v4067_v12 = vpop.permute.xlu1 %1661 }
 0x330   : > { %1825 = vrot.lane.b32.xlu1 %v4027_v7, %s5212_s27  ;;  %1875 = vrot.lane.b32.xlu0 %v4021_v34, %s5200_s16 }
 0x332   : > { %v4075_v59 = vpop.permute.xlu0 %1871  ;;  %v4077_v13 = vpop.permute.xlu1 %1665 }
 0x334   : > { %1877 = vrot.lane.b32.xlu1 %v4027_v7, %s5200_s16  ;;  %1619 = vrot.lane.b32.xlu0 %v4073_v52, %s5198_s21 }
 0x336   : > { %v4085_v14 = vpop.permute.xlu0 %1921  ;;  %v4087_v57 = vpop.permute.xlu1 %1659 }
 0x338   : > { %1621 = vrot.lane.b32.xlu1 %v4083_v9, %s5198_s21  ;;  %1671 = vrot.lane.b32.xlu0 %v4073_v52, %s5215_s2 }
 0x33a   : > { %v4093_v31 = vpop.permute.xlu0 %1925  ;;  %v4095_v1 = vpop.permute.xlu1 %1713 }
 0x33c   : > { %1673 = vrot.lane.b32.xlu1 %v4083_v9, %s5215_s2  ;;  %1723 = vrot.lane.b32.xlu0 %v4073_v52, %s5216_s3 }
 0x33e   : > { %v4101_v16 = vpop.permute.xlu0 %1585  ;;  %v4103_v56 = vpop.permute.xlu1 %1717 }
 0x340   : > { %1725 = vrot.lane.b32.xlu1 %v4083_v9, %s5216_s3  ;;  %1775 = vrot.lane.b32.xlu0 %v4073_v52, %s5211_s1 }
 0x342   : > { %v4109_v19 = vpop.permute.xlu1 %1711  ;;  %v4111_v53 = vpop.permute.xlu0 %1581 }
 0x344   : > { %1777 = vrot.lane.b32.xlu1 %v4083_v9, %s5211_s1  ;;  %1827 = vrot.lane.b32.xlu0 %v4073_v52, %s5212_s27 }
 0x346   : > { %v4117_v2 = vpop.permute.xlu1 %1765  ;;  %v4119_v54 = vpop.permute.xlu0 %1635 }
 0x348   : > { %1829 = vrot.lane.b32.xlu1 %v4083_v9, %s5212_s27  ;;  %1879 = vrot.lane.b32.xlu0 %v4073_v52, %s5200_s16 }
 0x34a   : > { %v4125_v20 = vpop.permute.xlu1 %1769  ;;  %v4127_v21 = vpop.permute.xlu0 %1639 }
 0x34c   : > { %1881 = vrot.lane.b32.xlu1 %v4083_v9, %s5200_s16  ;;  %1931 = vrot.lane.b32.xlu0 %v4073_v52, %s5197_s26 }
 0x34e   : > { %v4133_v23 = vpop.permute.xlu1 %1763  ;;  %v4135_v60 = vpop.permute.xlu0 %1633 }
 0x350   : > { %1933 = vrot.lane.b32.xlu1 %v4083_v9, %s5197_s26  ;;  %1929 = vrot.lane.b32.xlu0 %v4027_v7, %s5197_s26  ;;  %v4225_v9 = vpack.c.bf16 %v3982_v55, %v3982_v55 }
 0x352   : > { %v4141_v49 = vpop.permute.xlu1 %1817  ;;  %v4143_v17 = vpop.permute.xlu0 %1687  ;;  %5219 = vst [vmem:[#allocation12_spill] sm:$0xff] %v4225_v9 }
 0x354   : > { %1641 = vrot.lane.b32.xlu1 %v1576_v15, %s5204_s23  ;;  %1589 = vrot.lane.b32.xlu0 %v1576_v15, %s5203_s18 }
 0x356   : > { %v4148_v29 = vpop.permute.xlu1 %1821  ;;  %v4150_v30 = vpop.permute.xlu0 %1691 }
 0x358   : > { %1693 = vrot.lane.b32.xlu1 %v1576_v15, %s5205_s24  ;;  %1643 = vrot.lane.b32.xlu0 %v1577_v4, %s5204_s23 }
 0x35a   : > { %v4155_v58 = vpop.permute.xlu1 %1815  ;;  %v4157_v45 = vpop.permute.xlu0 %1685 }
 0x35c   : > { %1745 = vrot.lane.b32.xlu1 %v1576_v15, %s5206_s0  ;;  %1695 = vrot.lane.b32.xlu0 %v1577_v4, %s5205_s24 }
 0x35e   : > { %v4161_v36 = vpop.permute.xlu1 %1869  ;;  %v4163_v0 = vpop.permute.xlu0 %1739 }
 0x360   : > { %1797 = vrot.lane.b32.xlu1 %v1576_v15, %s5207_s14  ;;  %1747 = vrot.lane.b32.xlu0 %v1577_v4, %s5206_s0 }
 0x362   : > { %v4167_v37 = vpop.permute.xlu1 %1873  ;;  %v4169_v38 = vpop.permute.xlu0 %1743 }
 0x363   : > { %5217 = vst [vmem:[#allocation10_spill] sm:$0xff] %v4167_v37 }
 0x364   : > { %1849 = vrot.lane.b32.xlu1 %v1576_v15, %s5208_s13  ;;  %1799 = vrot.lane.b32.xlu0 %v1577_v4, %s5207_s14 }
 0x366   : > { %v4173_v44 = vpop.permute.xlu1 %1867  ;;  %v4175_v5 = vpop.permute.xlu0 %1737 }
 0x367   : > { %5218 = vst [vmem:[#allocation11_spill] sm:$0xff] %v4173_v44  ;;  %v1580_v44 = vrot.slane %v4225_v9, 4 }
 0x368   : > { %1901 = vrot.lane.b32.xlu1 %v1576_v15, %s5201_s22  ;;  %1851 = vrot.lane.b32.xlu0 %v1577_v4, %s5208_s13 }
 0x36a   : > { %v4179_v48 = vpop.permute.xlu1 %1919  ;;  %v4181_v61 = vpop.permute.xlu0 %1791 }
 0x36c   : > { %1593 = vrot.lane.b32.xlu1 %v1578_v40, %s5203_s18  ;;  %1903 = vrot.lane.b32.xlu0 %v1577_v4, %s5201_s22 }
 0x36e   : > { %v4186_v42 = vpop.permute.xlu1 %1637  ;;  %v4188_v33 = vpop.permute.xlu0 %1795 }
 0x370   : > { %1645 = vrot.lane.b32.xlu1 %v1578_v40, %s5204_s23  ;;  %1595 = vrot.lane.b32.xlu0 %v1579_v11, %s5203_s18 }
 0x372   : > { %v4193_v39 = vpop.permute.xlu1 %1689  ;;  %v4195_v26 = vpop.permute.xlu0 %1789 }
 0x374   : > { %1697 = vrot.lane.b32.xlu1 %v1578_v40, %s5205_s24  ;;  %1647 = vrot.lane.b32.xlu0 %v1579_v11, %s5204_s23 }
 0x376   : > { %v4199_v8 = vpop.permute.xlu1 %1741  ;;  %v4201_v46 = vpop.permute.xlu0 %1843 }
 0x378   : > { %1749 = vrot.lane.b32.xlu1 %v1578_v40, %s5206_s0  ;;  %1699 = vrot.lane.b32.xlu0 %v1579_v11, %s5205_s24 }
 0x37a   : > { %v4205_v50 = vpop.permute.xlu1 %1793  ;;  %v4207_v10 = vpop.permute.xlu0 %1847 }
 0x37c   : > { %1801 = vrot.lane.b32.xlu1 %v1578_v40, %s5207_s14  ;;  %1751 = vrot.lane.b32.xlu0 %v1579_v11, %s5206_s0 }
 0x37e   : > { %v4211_v28 = vpop.permute.xlu1 %1845  ;;  %v4213_v63 = vpop.permute.xlu0 %1841 }
 0x380   : > { %1853 = vrot.lane.b32.xlu1 %v1578_v40, %s5208_s13  ;;  %1803 = vrot.lane.b32.xlu0 %v1579_v11, %s5207_s14 }
 0x382   : > { %v4217_v15 = vpop.permute.xlu1 %1897  ;;  %v4219_v35 = vpop.permute.xlu0 %1895 }
 0x384   : > { %1905 = vrot.lane.b32.xlu1 %v1578_v40, %s5201_s22  ;;  %1855 = vrot.lane.b32.xlu0 %v1579_v11, %s5208_s13 }
 0x386   : > { %v1584_v7 = vpop.permute.xlu1 %1583  ;;  %v4227_v34 = vpop.permute.xlu0 %1899 }
 0x388   : > { %1591 = vrot.lane.b32.xlu1 %v1577_v4, %s5203_s18  ;;  %1907 = vrot.lane.b32.xlu0 %v1579_v11, %s5201_s22 }
 0x38a   : > { %v4231_v52 = vpop.permute.xlu1 %1587  ;;  %v4233_v24 = vpop.permute.xlu0 %1893 }
 0x38b   : > { %5220 = vst [vmem:[#allocation13_spill] sm:$0xff] %v4233_v24 }
 0x38c   : > { %1597 = vrot.lane.b32.xlu1 %v1580_v44, %s5203_s18  ;;  %1623 = vrot.lane.b32.xlu0 %v4225_v9, %s5198_s21 }
 0x38e   : > { %v4239_v55 = vpop.permute.xlu1 %1927  ;;  %v4241_v40 = vpop.permute.xlu0 %1615 }
 0x38f   : > { %5221 = vst [vmem:[#allocation14_spill] sm:$0xff] %v4239_v55  ;;  %5222 = vst [vmem:[#allocation15_spill] sm:$0xff] %v4241_v40 }
 0x390   : > { %1649 = vrot.lane.b32.xlu1 %v1580_v44, %s5204_s23  ;;  %1675 = vrot.lane.b32.xlu0 %v4225_v9, %s5215_s2 }
 0x392   : > { %v4246_v4 = vpop.permute.xlu1 %1617  ;;  %v4248_v11 = vpop.permute.xlu0 %1667 }
 0x393   : > { %5223 = vst [vmem:[#allocation16_spill] sm:$0xff] %v4246_v4  ;;  %5224 = vst [vmem:[#allocation17_spill] sm:$0xff] %v4248_v11 }
 0x394   : > { %1701 = vrot.lane.b32.xlu1 %v1580_v44, %s5205_s24  ;;  %1727 = vrot.lane.b32.xlu0 %v4225_v9, %s5216_s3 }
 0x396   : > { %v4253_v37 = vpop.permute.xlu1 %1669  ;;  %v4255_v24 = vpop.permute.xlu0 %1719 }
 0x397   : > { %5225 = vst [vmem:[#allocation18_spill] sm:$0xff] %v4253_v37  ;;  %5226 = vst [vmem:[#allocation19_spill] sm:$0xff] %v4255_v24 }
 0x398   : > { %1753 = vrot.lane.b32.xlu1 %v1580_v44, %s5206_s0  ;;  %1779 = vrot.lane.b32.xlu0 %v4225_v9, %s5211_s1 }
 0x39a   : > { %v4260_v40 = vpop.permute.xlu1 %1721  ;;  %v4262_v55 = vpop.permute.xlu0 %1771 }
 0x39b   : > { %5227 = vst [vmem:[#allocation20_spill] sm:$0xff] %v4260_v40  ;;  %5228 = vst [vmem:[#allocation21_spill] sm:$0xff] %v4262_v55 }
 0x39c   : > { %1805 = vrot.lane.b32.xlu1 %v1580_v44, %s5207_s14  ;;  %1831 = vrot.lane.b32.xlu0 %v4225_v9, %s5212_s27  ;;  %s434_s14 = sand.u32 1, %s3047_s29  }
 0x39d   : > { %s2838_s21 = sshll.u32 %s434_s14, 6  ;;  %s2705_s1 = scalar_lea.sflag [#allocation3], %s434_s14 }
 0x39e   : > { %v4267_v4 = vpop.permute.xlu1 %1773  ;;  %v4269_v11 = vpop.permute.xlu0 %1823 }
 0x39f   : > { %5229 = vst [vmem:[#allocation22_spill] sm:$0xff] %v4267_v4  ;;  %5230 = vst [vmem:[#allocation23_spill] sm:$0xff] %v4269_v11  ;;  %v1937_v4 = vsel %vm933_vm15, %v4179_v48, %v4085_v14  ;;  %v1938_v11 = vsel %vm933_vm15, %v4085_v14, %v4029_v22  ;;  %v1939_v48 = vsel %vm933_vm15, %v4029_v22, %v4093_v31 }
 0x3a0   : > { %1857 = vrot.lane.b32.xlu1 %v1580_v44, %s5208_s13  ;;  %1883 = vrot.lane.b32.xlu0 %v4225_v9, %s5200_s16  ;;  %v1599_v14 = vsel %vm582_vm1, %v4111_v53, %v1584_v7  ;;  %v1652_v53 = vsel %vm636_vm4, %v4119_v54, %v4186_v42  ;;  %s5062_s16 = scalar_lea.vmem [#allocation2], %s2838_s21 }
 0x3a2   : > { %v4274_v37 = vpop.permute.xlu1 %1825  ;;  %v4276_v24 = vpop.permute.xlu0 %1875 }
 0x3a3   : > { %5231 = vst [vmem:[#allocation24_spill] sm:$0xff] %v4274_v37  ;;  %v1601_v37 = vsel %vm582_vm1, %v4101_v16, %v4231_v52 }
 0x3a4   : > { %1909 = vrot.lane.b32.xlu1 %v1580_v44, %s5201_s22  ;;  %1935 = vrot.lane.b32.xlu0 %v4225_v9, %s5197_s26  ;;  %s2871_s22 = sshll.u32 %s3055_s10, 10 }
 0x3a5   : > { %s5081_s0 = scalar_lea.hbm %s5141_s9, %s2871_s22 }
 0x3a6   : > { %v4281_v40 = vpop.permute.xlu1 %1877  ;;  %v4283_v55 = vpop.permute.xlu0 %1619 }
 0x3a7   : > { %5232 = vst [vmem:[#allocation25_spill] sm:$0xff] %v4281_v40  ;;  %5233 = vst [vmem:[#allocation26_spill] sm:$0xff] %v4283_v55  ;;  %v1953_v55 = vsel %vm942_vm2, %v3914_v6, %v1601_v37  ;;  %v1600_v40 = vsel %vm582_vm1, %v1584_v7, %v4101_v16  ;;  %v1947_v6 = vsel %vm942_vm2, %v3933_v25, %v1599_v14 }
 0x3a8   : > { %2325 = vrot.lane.b32.xlu1 %v1938_v11, %s5203_s18  ;;  %2323 = vrot.lane.b32.xlu0 %v1937_v4, %s5203_s18  ;;  %v1950_v22 = vsel %vm942_vm2, %v3921_v3, %v1600_v40  ;;  %v1653_v7 = vsel %vm636_vm4, %v4186_v42, %v4127_v21  ;;  %v1626_v16 = vsel %vm609_vm3, %v4039_v41, %v4031_v51 }
 0x3a9   : > { %v1627_v3 = vsel %vm609_vm3, %v4031_v51, %v4048_v62  ;;  %v1977_v42 = vsel %vm942_vm2, %v1626_v16, %v1652_v53  ;;  %v1651_v40 = vsel %vm636_vm4, %v4135_v60, %v4119_v54  ;;  %v1625_v51 = vsel %vm609_vm3, %v4058_v47, %v4039_v41 }
 0x3aa   : > { %v4296_v44 = vpop.permute.xlu1 %1621  ;;  %v4298_v9 = vpop.permute.xlu0 %1671  ;;  %v1678_v14 = vsel %vm663_vm5, %v4067_v12, %v4037_v18  ;;  %v1974_v60 = vsel %vm942_vm2, %v1625_v51, %v1651_v40  ;;  %v1703_v53 = vsel %vm690_vm6, %v4157_v45, %v4143_v17  ;;  %v1705_v41 = vsel %vm690_vm6, %v4193_v39, %v4150_v30 }
 0x3ab   : > { %v1679_v47 = vsel %vm663_vm5, %v4037_v18, %v4077_v13  ;;  %v1757_v18 = vsel %vm744_vm8, %v4199_v8, %v4169_v38  ;;  %v1808_v51 = vsel %vm798_vm10, %v4181_v61, %v4205_v50 }
 0x3ac   : > { %2201 = vrot.lane.b32.xlu1 %v1953_v55, %s5203_s18  ;;  %2327 = vrot.lane.b32.xlu0 %v1939_v48, %s5203_s18  ;;  %v1980_v55 = vsel %vm942_vm2, %v1627_v3, %v1653_v7  ;;  %v1704_v48 = vsel %vm690_vm6, %v4143_v17, %v4193_v39  ;;  %v1677_v7 = vsel %vm663_vm5, %v4087_v57, %v4067_v12 }
 0x3ad   : > { %v2004_v54 = vsel %vm942_vm2, %v1678_v14, %v1704_v48  ;;  %v2001_v17 = vsel %vm942_vm2, %v1677_v7, %v1703_v53  ;;  %v2007_v45 = vsel %vm942_vm2, %v1679_v47, %v1705_v41  ;;  %v1756_v39 = vsel %vm744_vm8, %v4163_v0, %v4199_v8 }
 0x3ae   : > { %v4311_v4 = vpop.permute.xlu1 %1673  ;;  %v4313_v11 = vpop.permute.xlu0 %1723  ;;  %v1730_v12 = vsel %vm717_vm7, %v4095_v1, %v4046_v27  ;;  %v1731_v57 = vsel %vm717_vm7, %v4046_v27, %v4103_v56  ;;  %v1755_v48 = vsel %vm744_vm8, %v4175_v5, %v4163_v0  ;;  %v1729_v27 = vsel %vm717_vm7, %v4109_v19, %v4095_v1 }
 0x3af   : > { %v2034_v40 = vsel %vm942_vm2, %v1731_v57, %v1757_v18  ;;  %v2031_v8 = vsel %vm942_vm2, %v1730_v12, %v1756_v39  ;;  %v1782_v14 = vsel %vm771_vm9, %v4117_v2, %v4056_v43  ;;  %v2028_v5 = vsel %vm942_vm2, %v1729_v27, %v1755_v48 }
 0x3b0   : > { %2197 = vrot.lane.b32.xlu1 %v1947_v6, %s5203_s18  ;;  %2199 = vrot.lane.b32.xlu0 %v1950_v22, %s5203_s18  ;;  %v2058_v0 = vsel %vm942_vm2, %v1782_v14, %v1808_v51  ;;  %v1807_v53 = vsel %vm798_vm10, %v4195_v26, %v4181_v61  ;;  %v1809_v41 = vsel %vm798_vm10, %v4205_v50, %v4188_v33  ;;  %v5234_v51 = vld [vmem:[#allocation13_spill] sm:$0xff]  ;;  %v5236_v14 = vld [vmem:[#allocation11_spill] sm:$0xff] }
 0x3b1   : > { %v1783_v1 = vsel %vm771_vm9, %v4056_v43, %v4125_v20  ;;  %v1781_v19 = vsel %vm771_vm9, %v4133_v23, %v4117_v2  ;;  %v1860_v50 = vsel %vm852_vm12, %v4201_v46, %v4211_v28  ;;  %v1861_v43 = vsel %vm852_vm12, %v4211_v28, %v4207_v10 }
 0x3b2   : > { %v4333_v25 = vpop.permute.xlu1 %1725  ;;  %v4335_v37 = vpop.permute.xlu0 %1775  ;;  %v2055_v61 = vsel %vm942_vm2, %v1781_v19, %v1807_v53  ;;  %v2061_v26 = vsel %vm942_vm2, %v1783_v1, %v1809_v41  ;;  %v1834_v2 = vsel %vm825_vm11, %v4141_v49, %v4065_v32  ;;  %v1835_v23 = vsel %vm825_vm11, %v4065_v32, %v4148_v29 }
 0x3b3   : > { %v2088_v39 = vsel %vm942_vm2, %v1835_v23, %v1861_v43  ;;  %v2085_v28 = vsel %vm942_vm2, %v1834_v2, %v1860_v50  ;;  %v1859_v18 = vsel %vm852_vm12, %v4213_v63, %v4201_v46  ;;  %v1912_v12 = vsel %vm906_vm14, %v4219_v35, %v4217_v15  ;;  %v5238_v23 = vld [vmem:[#allocation17_spill] sm:$0xff] }
 0x3b4   : > { %2219 = vrot.lane.b32.xlu1 %v1980_v55, %s5203_s18  ;;  %2217 = vrot.lane.b32.xlu0 %v1977_v42, %s5203_s18  ;;  %v1833_v32 = vsel %vm825_vm11, %v4155_v58, %v4141_v49  ;;  %v1886_v57 = vsel %vm879_vm13, %v4161_v36, %v4075_v59  ;;  %v1913_v48 = vsel %vm906_vm14, %v4217_v15, %v4227_v34  ;;  %v5235_v58 = vld [vmem:[#allocation10_spill] sm:$0xff] }
 0x3b5   : > { %v2082_v46 = vsel %vm942_vm2, %v1833_v32, %v1859_v18  ;;  %v2112_v63 = vsel %vm942_vm2, %v1886_v57, %v1912_v12  ;;  %v1911_v49 = vsel %vm906_vm14, %v5234_v51, %v4219_v35  ;;  %v1887_v27 = vsel %vm879_vm13, %v4075_v59, %v5235_v58  ;;  %v5237_v59 = vld [vmem:[#allocation14_spill] sm:$0xff]  ;;  %v5239_v18 = vld [vmem:[#allocation5_spill] sm:$0xff] }
 0x3b6   : > { %v4353_v6 = vpop.permute.xlu1 %1777  ;;  %v4355_v22 = vpop.permute.xlu0 %1827  ;;  %v2115_v15 = vsel %vm942_vm2, %v1887_v27, %v1913_v48  ;;  %v1940_v19 = vsel %vm933_vm15, %v4093_v31, %v5237_v59  ;;  %v5241_v57 = vld [vmem:[#allocation21_spill] sm:$0xff]  ;;  %v1888_v27 = vsel %vm879_vm13, %v5235_v58, %v4276_v24 }
 0x3b8   : > { %2235 = vrot.lane.b32.xlu1 %v2004_v54, %s5203_s18  ;;  %2215 = vrot.lane.b32.xlu0 %v1974_v60, %s5203_s18 }
 0x3ba   : > { %v4373_v16 = vpop.permute.xlu1 %1829  ;;  %v4375_v3 = vpop.permute.xlu0 %1879 }
 0x3bc   : > { %2233 = vrot.lane.b32.xlu1 %v2001_v17, %s5203_s18  ;;  %2237 = vrot.lane.b32.xlu0 %v2007_v45, %s5203_s18 }
 0x3be   : > { %v4393_v55 = vpop.permute.xlu1 %1881  ;;  %v4395_v42 = vpop.permute.xlu0 %1931 }
 0x3c0   : > { %2255 = vrot.lane.b32.xlu1 %v2034_v40, %s5203_s18  ;;  %2253 = vrot.lane.b32.xlu0 %v2031_v8, %s5203_s18 }
 0x3c2   : > { %v4413_v54 = vpop.permute.xlu1 %1933  ;;  %v1930_v60 = vpop.permute.xlu0 %1929 }
 0x3c3   : > { %v1942_v50 = vsel %vm933_vm15, %v1930_v60, %v4395_v42  ;;  %v1943_v43 = vsel %vm933_vm15, %v4395_v42, %v4413_v54 }
 0x3c4   : > { %2271 = vrot.lane.b32.xlu1 %v2058_v0, %s5203_s18  ;;  %2251 = vrot.lane.b32.xlu0 %v2028_v5, %s5203_s18  ;;  %v1885_v0 = vsel %vm879_vm13, %v5236_v14, %v4161_v36  ;;  %v1941_v36 = vsel %vm933_vm15, %v5237_v59, %v1930_v60  ;;  %v1680_v60 = vsel %vm663_vm5, %v4077_v13, %v5238_v23  ;;  %v5240_v13 = vld [vmem:[#allocation15_spill] sm:$0xff] }
 0x3c5   : > { %v2109_v41 = vsel %vm942_vm2, %v1885_v0, %v1911_v49  ;;  %v1628_v32 = vsel %vm609_vm3, %v4048_v62, %v5240_v13  ;;  %v5242_v62 = vld [vmem:[#allocation19_spill] sm:$0xff] }
 0x3c6   : > { %v4431_v47 = vpop.permute.xlu1 %1641  ;;  %v4433_v7 = vpop.permute.xlu0 %1589 }
 0x3c7   : > { %v1602_v31 = vsel %vm582_vm1, %v4231_v52, %v4433_v7 }
 0x3c8   : > { %2269 = vrot.lane.b32.xlu1 %v2055_v61, %s5203_s18  ;;  %2273 = vrot.lane.b32.xlu0 %v2061_v26, %s5203_s18  ;;  %v1956_v52 = vsel %vm942_vm2, %v5239_v18, %v1602_v31 }
 0x3ca   : > { %v4451_v17 = vpop.permute.xlu1 %1693  ;;  %v4453_v45 = vpop.permute.xlu0 %1643 }
 0x3cb   : > { %v1706_v2 = vsel %vm690_vm6, %v4150_v30, %v4451_v17  ;;  %v1654_v30 = vsel %vm636_vm4, %v4127_v21, %v4431_v47 }
 0x3cc   : > { %2291 = vrot.lane.b32.xlu1 %v2088_v39, %s5203_s18  ;;  %2289 = vrot.lane.b32.xlu0 %v2085_v28, %s5203_s18  ;;  %v2010_v42 = vsel %vm942_vm2, %v1680_v60, %v1706_v2  ;;  %v5245_v60 = vld [vmem:[#allocation22_spill] sm:$0xff] }
 0x3ce   : > { %v4471_v40 = vpop.permute.xlu1 %1745  ;;  %v4473_v8 = vpop.permute.xlu0 %1695 }
 0x3cf   : > { %v1758_v51 = vsel %vm744_vm8, %v4169_v38, %v4471_v40 }
 0x3d0   : > { %2287 = vrot.lane.b32.xlu0 %v2082_v46, %s5203_s18  ;;  %2307 = vrot.lane.b32.xlu1 %v2112_v63, %s5203_s18  ;;  %v1784_v46 = vsel %vm771_vm9, %v4125_v20, %v5241_v57  ;;  %v1732_v20 = vsel %vm717_vm7, %v4103_v56, %v5242_v62  ;;  %v5243_v56 = vld [vmem:[#allocation23_spill] sm:$0xff] }
 0x3d1   : > { %v1836_v58 = vsel %vm825_vm11, %v4148_v29, %v5243_v56 }
 0x3d2   : > { %v1798_v5 = vpop.permute.xlu1 %1797  ;;  %v4491_v53 = vpop.permute.xlu0 %1747 }
 0x3d3   : > { %v1810_v12 = vsel %vm798_vm10, %v4188_v33, %v1798_v5  ;;  %v1983_v33 = vsel %vm942_vm2, %v1628_v32, %v1654_v30  ;;  %v5246_v30 = vld [vmem:[#allocation25_spill] sm:$0xff] }
 0x3d4   : > { %2309 = vrot.lane.b32.xlu0 %v2115_v15, %s5203_s18  ;;  %2305 = vrot.lane.b32.xlu1 %v2109_v41, %s5203_s18  ;;  %v2064_v21 = vsel %vm942_vm2, %v1784_v46, %v1810_v12 }
 0x3d6   : > { %v4497_v35 = vpop.permute.xlu1 %1849  ;;  %v4499_v1 = vpop.permute.xlu0 %1799 }
 0x3d7   : > { %v1862_v15 = vsel %vm852_vm12, %v4207_v10, %v4497_v35  ;;  %v5244_v10 = vld [vmem:[#allocation18_spill] sm:$0xff]  ;;  %v1811_v2 = vsel %vm798_vm10, %v1798_v5, %v4499_v1  ;;  %v1889_v5 = vsel %vm879_vm13, %v4276_v24, %v5246_v30 }
 0x3d8   : > { %2329 = vrot.lane.b32.xlu1 %v1940_v19, %s5203_s18  ;;  %2331 = vrot.lane.b32.xlu0 %v1941_v36, %s5203_s18  ;;  %v2091_v19 = vsel %vm942_vm2, %v1836_v58, %v1862_v15  ;;  %v1707_v36 = vsel %vm690_vm6, %v4451_v17, %v4473_v8  ;;  %v1785_v17 = vsel %vm771_vm9, %v5241_v57, %v5245_v60 }
 0x3da   : > { %v1902_v61 = vpop.permute.xlu1 %1901  ;;  %v4508_v26 = vpop.permute.xlu0 %1851 }
 0x3db   : > { %v1914_v49 = vsel %vm906_vm14, %v4227_v34, %v1902_v61  ;;  %v2037_v34 = vsel %vm942_vm2, %v1732_v20, %v1758_v51  ;;  %v5247_v51 = vld [vmem:[#allocation8_spill] sm:$0xff]  ;;  %v5248_v20 = vld [vmem:[#allocation6_spill] sm:$0xff] }
 0x3dc   : > { %2333 = vrot.lane.b32.xlu1 %v1942_v50, %s5203_s18  ;;  %2335 = vrot.lane.b32.xlu0 %v1943_v43, %s5203_s18  ;;  %v2118_v38 = vsel %vm942_vm2, %v1888_v27, %v1914_v49  ;;  %v1681_v50 = vsel %vm663_vm5, %v5238_v23, %v5244_v10  ;;  %v2067_v23 = vsel %vm942_vm2, %v1785_v17, %v1811_v2 }
 0x3dd   : > { %v2013_v29 = vsel %vm942_vm2, %v1681_v50, %v1707_v36  ;;  %v1759_v2 = vsel %vm744_vm8, %v4471_v40, %v4491_v53 }
 0x3de   : > { %v4526_v39 = vpop.permute.xlu1 %1593  ;;  %v4528_v28 = vpop.permute.xlu0 %1903 }
 0x3e0   : > { %2239 = vrot.lane.b32.xlu1 %v2010_v42, %s5203_s18  ;;  %2203 = vrot.lane.b32.xlu0 %v1956_v52, %s5203_s18  ;;  %v1915_v52 = vsel %vm906_vm14, %v1902_v61, %v4528_v28 }
 0x3e1   : > { %v2121_v57 = vsel %vm942_vm2, %v1889_v5, %v1915_v52  ;;  %v5251_v52 = vld [vmem:[#allocation20_spill] sm:$0xff] }
 0x3e2   : > { %v4546_v63 = vpop.permute.xlu1 %1645  ;;  %v4548_v48 = vpop.permute.xlu0 %1595  ;;  %v1733_v5 = vsel %vm717_vm7, %v5242_v62, %v5251_v52  ;;  %v1735_v62 = vsel %vm717_vm7, %v4313_v11, %v4333_v25 }
 0x3e3   : > { %v1605_v46 = vsel %vm582_vm1, %v4526_v39, %v4548_v48 }
 0x3e4   : > { %2275 = vrot.lane.b32.xlu1 %v2064_v21, %s5203_s18  ;;  %2221 = vrot.lane.b32.xlu0 %v1983_v33, %s5203_s18  ;;  %v1965_v24 = vsel %vm942_vm2, %v5247_v51, %v1605_v46  ;;  %v2040_v46 = vsel %vm942_vm2, %v1733_v5, %v1759_v2  ;;  %v5253_v2 = vld [vmem:[#allocation7_spill] sm:$0xff] }
 0x3e6   : > { %v4565_v14 = vpop.permute.xlu1 %1697  ;;  %v4567_v0 = vpop.permute.xlu0 %1647 }
 0x3e7   : > { %v1657_v49 = vsel %vm636_vm4, %v4546_v63, %v4567_v0 }
 0x3e8   : > { %2311 = vrot.lane.b32.xlu1 %v2118_v38, %s5203_s18  ;;  %2257 = vrot.lane.b32.xlu0 %v2037_v34, %s5203_s18  ;;  %v1655_v38 = vsel %vm636_vm4, %v4431_v47, %v4453_v45 }
 0x3ea   : > { %v4579_v41 = vpop.permute.xlu1 %1749  ;;  %v4581_v59 = vpop.permute.xlu0 %1699 }
 0x3eb   : > { %v1709_v47 = vsel %vm690_vm6, %v4565_v14, %v4581_v59 }
 0x3ec   : > { %2293 = vrot.lane.b32.xlu0 %v2091_v19, %s5203_s18  ;;  %v5250_v19 = vld [vmem:[#allocation16_spill] sm:$0xff] }
 0x3ed   : > { %v1629_v36 = vsel %vm609_vm3, %v5240_v13, %v5250_v19  ;;  %v1683_v13 = vsel %vm663_vm5, %v4298_v9, %v4311_v4 }
 0x3ee   : > { %v4591_v43 = vpop.permute.xlu1 %1801  ;;  %v4593_v31 = vpop.permute.xlu0 %1751 }
 0x3ef   : > { %v1761_v40 = vsel %vm744_vm8, %v4579_v41, %v4593_v31 }
 0x3f0   : > { %2241 = vrot.lane.b32.xlu0 %v2013_v29, %s5203_s18  ;;  %v1986_v29 = vsel %vm942_vm2, %v1629_v36, %v1655_v38  ;;  %v1787_v36 = vsel %vm771_vm9, %v4335_v37, %v4353_v6 }
 0x3f2   : > { %v4602_v42 = vpop.permute.xlu1 %1853  ;;  %v4604_v18 = vpop.permute.xlu0 %1803 }
 0x3f4   : > { %2277 = vrot.lane.b32.xlu0 %v2067_v23, %s5203_s18 }
 0x3f6   : > { %v4613_v12 = vpop.permute.xlu1 %1905  ;;  %v4615_v32 = vpop.permute.xlu0 %1855 }
 0x3f8   : > { %2313 = vrot.lane.b32.xlu0 %v2121_v57, %s5203_s18  ;;  %v2019_v57 = vsel %vm942_vm2, %v1683_v13, %v1709_v47  ;;  %v1839_v13 = vsel %vm825_vm11, %v4355_v22, %v4373_v16 }
 0x3fa   : > { %v1592_v21 = vpop.permute.xlu1 %1591  ;;  %v4622_v61 = vpop.permute.xlu0 %1907 }
 0x3fb   : > { %v1603_v33 = vsel %vm582_vm1, %v4433_v7, %v1592_v21  ;;  %v5249_v7 = vld [vmem:[#allocation26_spill] sm:$0xff] }
 0x3fc   : > { %2209 = vrot.lane.b32.xlu0 %v1965_v24, %s5203_s18  ;;  %v1959_v27 = vsel %vm942_vm2, %v5248_v20, %v1603_v33  ;;  %v1631_v34 = vsel %vm609_vm3, %v5249_v7, %v4296_v44  ;;  %v1863_v33 = vsel %vm852_vm12, %v4497_v35, %v4508_v26  ;;  %v1813_v35 = vsel %vm798_vm10, %v4591_v43, %v4604_v18 }
 0x3fd   : > { %2205 = vrot.lane.b32.xlu1 %v1959_v27, %s5203_s18  ;;  %v1992_v50 = vsel %vm942_vm2, %v1631_v34, %v1657_v49  ;;  %v5252_v49 = vld [vmem:[#allocation24_spill] sm:$0xff]  ;;  %v2046_v27 = vsel %vm942_vm2, %v1735_v62, %v1761_v40  ;;  %v1604_v34 = vsel %vm582_vm1, %v1592_v21, %v4526_v39  ;;  %v2073_v47 = vsel %vm942_vm2, %v1787_v36, %v1813_v35 }
 0x3fe   : > { %v4641_v15 = vpop.permute.xlu1 %1597  ;;  %v4643_v58 = vpop.permute.xlu0 %1623  ;;  %v1837_v20 = vsel %vm825_vm11, %v5243_v56, %v5252_v49  ;;  %v1962_v39 = vsel %vm942_vm2, %v5253_v2, %v1604_v34  ;;  %v1656_v21 = vsel %vm636_vm4, %v4453_v45, %v4546_v63  ;;  %v1630_v40 = vsel %vm609_vm3, %v5250_v19, %v5249_v7 }
 0x3ff   : > { %v2094_v38 = vsel %vm942_vm2, %v1837_v20, %v1863_v33  ;;  %v1917_v45 = vsel %vm906_vm14, %v4613_v12, %v4622_v61  ;;  %v1989_v63 = vsel %vm942_vm2, %v1630_v40, %v1656_v21  ;;  %v1708_v33 = vsel %vm690_vm6, %v4473_v8, %v4565_v14 }
 0x400   : > { %2227 = vrot.lane.b32.xlu0 %v1992_v50, %s5203_s18  ;;  %v1891_v7 = vsel %vm879_vm13, %v4375_v3, %v4393_v55  ;;  %v1682_v20 = vsel %vm663_vm5, %v5244_v10, %v4298_v9  ;;  %v1760_v14 = vsel %vm744_vm8, %v4491_v53, %v4579_v41  ;;  %v1734_v9 = vsel %vm717_vm7, %v5251_v52, %v4313_v11  ;;  %v5254_v10 = vld [vmem:[#allocation12_spill] sm:$0xff] }
 0x401   : > { %2223 = vrot.lane.b32.xlu1 %v1986_v29, %s5203_s18  ;;  %v1865_v29 = vsel %vm852_vm12, %v4602_v42, %v4615_v32  ;;  %v2016_v8 = vsel %vm942_vm2, %v1682_v20, %v1708_v33  ;;  %v1971_v34 = vsel %vm942_vm2, %v5254_v10, %v4641_v15  ;;  %v2043_v36 = vsel %vm942_vm2, %v1734_v9, %v1760_v14 }
 0x402   : > { %v4661_v17 = vpop.permute.xlu1 %1649  ;;  %v4663_v23 = vpop.permute.xlu0 %1675  ;;  %v1812_v53 = vsel %vm798_vm10, %v4499_v1, %v4591_v43  ;;  %v1786_v11 = vsel %vm771_vm9, %v5245_v60, %v4335_v37  ;;  %v1864_v1 = vsel %vm852_vm12, %v4508_v26, %v4602_v42  ;;  %v1838_v37 = vsel %vm825_vm11, %v5252_v49, %v4355_v22 }
 0x403   : > { %v1998_v52 = vsel %vm942_vm2, %v4643_v58, %v4661_v17  ;;  %v1916_v26 = vsel %vm906_vm14, %v4528_v28, %v4613_v12  ;;  %v1890_v22 = vsel %vm879_vm13, %v5246_v30, %v4375_v3  ;;  %v1606_v12 = vsel %vm582_vm1, %v4548_v48, %v4641_v15 }
 0x404   : > { %2245 = vrot.lane.b32.xlu0 %v2019_v57, %s5203_s18  ;;  %v2124_v28 = vsel %vm942_vm2, %v1890_v22, %v1916_v26  ;;  %v1658_v48 = vsel %vm636_vm4, %v4567_v0, %v4661_v17  ;;  %v1632_v20 = vsel %vm609_vm3, %v4296_v44, %v4643_v58  ;;  %v1684_v44 = vsel %vm663_vm5, %v4311_v4, %v4663_v23 }
 0x405   : > { %2259 = vrot.lane.b32.xlu1 %v2040_v46, %s5203_s18  ;;  %v2100_v46 = vsel %vm942_vm2, %v1839_v13, %v1865_v29  ;;  %v2070_v29 = vsel %vm942_vm2, %v1786_v11, %v1812_v53  ;;  %v1995_v14 = vsel %vm942_vm2, %v1632_v20, %v1658_v48 }
 0x406   : > { %v4681_v51 = vpop.permute.xlu1 %1701  ;;  %v4683_v24 = vpop.permute.xlu0 %1727 }
 0x407   : > { %v2025_v60 = vsel %vm942_vm2, %v4663_v23, %v4681_v51  ;;  %v1710_v0 = vsel %vm690_vm6, %v4581_v59, %v4681_v51 }
 0x408   : > { %2263 = vrot.lane.b32.xlu0 %v2046_v27, %s5203_s18  ;;  %v2127_v27 = vsel %vm942_vm2, %v1891_v7, %v1917_v45  ;;  %v2022_v59 = vsel %vm942_vm2, %v1684_v44, %v1710_v0 }
 0x409   : > { %2295 = vrot.lane.b32.xlu1 %v2094_v38, %s5203_s18 }
 0x40a   : > { %v4700_v56 = vpop.permute.xlu1 %1753  ;;  %v4702_v50 = vpop.permute.xlu0 %1779 }
 0x40b   : > { %v2052_v49 = vsel %vm942_vm2, %v4683_v24, %v4700_v56  ;;  %v1762_v51 = vsel %vm744_vm8, %v4593_v31, %v4700_v56  ;;  %v2666_v56 = vld [vmem:[%s5140_s8] sm:$0xff] }
 0x40c   : > { %2281 = vrot.lane.b32.xlu0 %v2073_v47, %s5203_s18 }
 0x40d   : > { %2207 = vrot.lane.b32.xlu1 %v1962_v39, %s5203_s18  ;;  %v2097_v39 = vsel %vm942_vm2, %v1838_v37, %v1864_v1 }
 0x40e   : > { %v4718_v5 = vpop.permute.xlu1 %1805  ;;  %v4720_v57 = vpop.permute.xlu0 %1831 }
 0x40f   : > { %v1814_v31 = vsel %vm798_vm10, %v4604_v18, %v4718_v5 }
 0x410   : > { %2299 = vrot.lane.b32.xlu0 %v2100_v46, %s5203_s18  ;;  %v2079_v46 = vsel %vm942_vm2, %v4702_v50, %v4718_v5 }
 0x411   : > { %2225 = vrot.lane.b32.xlu1 %v1989_v63, %s5203_s18  ;;  %v5255_v63 = vld [vmem:[#allocation9_spill] sm:$0xff] }
 0x412   : > { %v4738_v19 = vpop.permute.xlu1 %1857  ;;  %v4740_v62 = vpop.permute.xlu0 %1883  ;;  %v1968_v33 = vsel %vm942_vm2, %v5255_v63, %v1606_v12 }
 0x413   : > { %v1866_v18 = vsel %vm852_vm12, %v4615_v32, %v4738_v19 }
 0x414   : > { %2317 = vrot.lane.b32.xlu0 %v2127_v27, %s5203_s18  ;;  %v2106_v27 = vsel %vm942_vm2, %v4720_v57, %v4738_v19 }
 0x415   : > { %2243 = vrot.lane.b32.xlu1 %v2016_v8, %s5203_s18 }
 0x416   : > { %v4752_v35 = vpop.permute.xlu1 %1909  ;;  %v4754_v38 = vpop.permute.xlu0 %1935 }
 0x417   : > { %v2133_v58 = vsel %vm942_vm2, %v4740_v62, %v4752_v35  ;;  %v1918_v32 = vsel %vm906_vm14, %v4622_v61, %v4752_v35  ;;  %v1944_v22 = vsel %vm933_vm15, %v4413_v54, %v4754_v38 }
 0x418   : > { %2213 = vrot.lane.b32.xlu0 %v1971_v34, %s5203_s18 }
 0x419   : > { %2261 = vrot.lane.b32.xlu1 %v2043_v36, %s5203_s18  ;;  %v1736_v36 = vsel %vm717_vm7, %v4333_v25, %v4683_v24 }
 0x41a   : > { %v4768_v41 = vpop.permute.xlu1 %2325  ;;  %v4770_v47 = vpop.permute.xlu0 %2323  ;;  %v2049_v11 = vsel %vm942_vm2, %v1736_v36, %v1762_v51 }
 0x41b   : > { %v2397_v54 = vsel %vm582_vm1, %v4770_v47, %v4768_v41 }
 0x41c   : > { %2231 = vrot.lane.b32.xlu0 %v1998_v52, %s5203_s18  ;;  %v1788_v52 = vsel %vm771_vm9, %v4353_v6, %v4702_v50  ;;  %v2465_v12 = vsel %vm942_vm2, %v2397_v54, 0 }
 0x41d   : > { %2279 = vrot.lane.b32.xlu1 %v2070_v29, %s5203_s18  ;;  %v2076_v1 = vsel %vm942_vm2, %v1788_v52, %v1814_v31 }
 0x41e   : > { %v4784_v43 = vpop.permute.xlu1 %2201  ;;  %v4786_v2 = vpop.permute.xlu0 %2327 }
 0x420   : > { %2249 = vrot.lane.b32.xlu0 %v2025_v60, %s5203_s18  ;;  %v1840_v60 = vsel %vm825_vm11, %v4373_v16, %v4720_v57  ;;  %v1892_v16 = vsel %vm879_vm13, %v4393_v55, %v4740_v62 }
 0x421   : > { %2297 = vrot.lane.b32.xlu1 %v2097_v39, %s5203_s18  ;;  %v2103_v39 = vsel %vm942_vm2, %v1840_v60, %v1866_v18 }
 0x422   : > { %v2198_v42 = vpop.permute.xlu1 %2197  ;;  %v2200_v21 = vpop.permute.xlu0 %2199 }
 0x423   : > { %v2341_v13 = vsel %vm582_vm1, %v2198_v42, %v2200_v21  ;;  %v2342_v40 = vsel %vm582_vm1, %v2200_v21, %v4784_v43  ;;  %v2130_v42 = vsel %vm942_vm2, %v1892_v16, %v1918_v32 }
 0x424   : > { %2267 = vrot.lane.b32.xlu0 %v2052_v49, %s5203_s18  ;;  %2488 = vmatprep.subr.bf16.mxu1 %v2342_v40  ;;  %v2652_v49 = vld [vmem:[%s5139_s7] sm:$0xff] }
 0x425   : > { %2315 = vrot.lane.b32.xlu1 %v2124_v28, %s5203_s18  ;;  %2489 = vmatpush1.bf16.msra.mxu1 %v2341_v13 }
 0x426   : > { %v4815_v3 = vpop.permute.xlu1 %2219  ;;  %v2218_v30 = vpop.permute.xlu0 %2217 }
 0x427   : > { %v2350_v45 = vsel %vm582_vm1, %v2218_v30, %v4815_v3 }
 0x428   : > { %2285 = vrot.lane.b32.xlu0 %v2079_v46, %s5203_s18  ;;  %2490 = vmatprep.subr.bf16.mxu1 %v2350_v45 }
 0x429   : > { %2211 = vrot.lane.b32.xlu1 %v1968_v33, %s5203_s18 }
 0x42a   : > { %v2236_v15 = vpop.permute.xlu1 %2235  ;;  %v2216_v7 = vpop.permute.xlu0 %2215 }
 0x42b   : > { %v2349_v8 = vsel %vm582_vm1, %v2216_v7, %v2218_v30  ;;  %v4933_v30 = vld [vmem:[%s5138_s6] sm:$0xf] }
 0x42c   : > { %2303 = vrot.lane.b32.xlu0 %v2106_v27, %s5203_s18  ;;  %2491 = vmatpush1.bf16.msra.mxu1 %v2349_v8 }
 0x42d   : > { %2229 = vrot.lane.b32.xlu1 %v1995_v14, %s5203_s18 }
 0x42e   : > { %v2234_v17 = vpop.permute.xlu1 %2233  ;;  %v4842_v9 = vpop.permute.xlu0 %2237 }
 0x42f   : > { %v2357_v10 = vsel %vm582_vm1, %v2234_v17, %v2236_v15  ;;  %v2358_v34 = vsel %vm582_vm1, %v2236_v15, %v4842_v9 }
 0x430   : > { %2321 = vrot.lane.b32.xlu0 %v2133_v58, %s5203_s18  ;;  %2492 = vmatprep.subr.bf16.mxu1 %v2358_v34 }
 0x431   : > { %2247 = vrot.lane.b32.xlu1 %v2022_v59, %s5203_s18  ;;  %2493 = vmatpush1.bf16.msra.mxu1 %v2357_v10 }
 0x432   : > { %v4859_v4 = vpop.permute.xlu1 %2255  ;;  %v2254_v23 = vpop.permute.xlu0 %2253 }
 0x433   : > { %v2366_v53 = vsel %vm582_vm1, %v2254_v23, %v4859_v4 }
 0x434   : > { %2339 = vrot.lane.b32.xlu0 %v4754_v38, %s5203_s18  ;;  %2494 = vmatprep.subr.bf16.mxu1 %v2366_v53  ;;  %v2398_v38 = vsel %vm582_vm1, %v4768_v41, %v4786_v2  ;;  %v5256_v41 = vmov 0  }
 0x435   : > { %2265 = vrot.lane.b32.xlu1 %v2049_v11, %s5203_s18 }
 0x436   : > { %v2272_v25 = vpop.permute.xlu1 %2271  ;;  %v2252_v24 = vpop.permute.xlu0 %2251 }
 0x437   : > { %v2365_v29 = vsel %vm582_vm1, %v2252_v24, %v2254_v23 }
 0x438   : > { %2669 = vperm.xlu0 %2975, %v2666_v56   ;;  %2495 = vmatpush1.bf16.msra.mxu1 %v2365_v29 }
 0x439   : > { %2283 = vrot.lane.b32.xlu1 %v2076_v1, %s5203_s18 }
 0x43a   : > { %v2270_v5 = vpop.permute.xlu1 %2269  ;;  %v4885_v37 = vpop.permute.xlu0 %2273 }
 0x43b   : > { %v2373_v6 = vsel %vm582_vm1, %v2270_v5, %v2272_v25  ;;  %v2374_v50 = vsel %vm582_vm1, %v2272_v25, %v4885_v37 }
 0x43c   : > { %2496 = vmatprep.subr.bf16.mxu1 %v2374_v50 }
 0x43d   : > { %2301 = vrot.lane.b32.xlu1 %v2103_v39, %s5203_s18  ;;  %2497 = vmatpush1.bf16.msra.mxu1 %v2373_v6 }
 0x43e   : > { %v4898_v19 = vpop.permute.xlu1 %2291  ;;  %v2290_v26 = vpop.permute.xlu0 %2289 }
 0x43f   : > { %v2382_v57 = vsel %vm582_vm1, %v2290_v26, %v4898_v19 }
 0x440   : > { %2498 = vmatprep.subr.bf16.mxu1 %v2382_v57 }
 0x441   : > { %2319 = vrot.lane.b32.xlu1 %v2130_v42, %s5203_s18 }
 0x442   : > { %v2308_v21 = vpop.permute.xlu1 %2307  ;;  %v2288_v61 = vpop.permute.xlu0 %2287 }
 0x443   : > { %v2381_v35 = vsel %vm582_vm1, %v2288_v61, %v2290_v26 }
 0x444   : > { %2499 = vmatpush1.bf16.msra.mxu1 %v2381_v35 }
 0x445   : > { %2337 = vrot.lane.b32.xlu1 %v1944_v22, %s5203_s18  ;;  %s2721_s18 = sshll.u32 %s5062_s16, 4  ;;  %s5083_s18 = int_to_ptr.vmem [resolvable:$true] %s2721_s18 }
 0x446   : > { %v2306_v55 = vpop.permute.xlu1 %2305  ;;  %v4912_v62 = vpop.permute.xlu0 %2309  ;;  %s2985_s10 = scalar_lea.vmem %s5083_s18, 1024 }
 0x447   : > { %v2389_v13 = vsel %vm582_vm1, %v2306_v55, %v2308_v21  ;;  %v2390_v40 = vsel %vm582_vm1, %v2308_v21, %v4912_v62  ;;  %p2986_p12 = scmp.ne.s32.totalorder %s5083_s18, %s2985_s10 }
 0x448   : > { %2500 = vmatprep.subr.bf16.mxu1 %v2390_v40 }
 0x449   : > { %2655 = vperm.xlu1 %2976, %v2652_v49   ;;  %2501 = vmatpush1.bf16.msra.mxu1 %v2389_v13  ;;  %p2987_p13 = pnand %p2986_p12, %p3175_p4 }
 0x44a   : > { %2854 = vmatprep.subr.msk.bf16.mxu1 %vm942_vm2, %v2398_v38  ;;  %v4927_v28 = vpop.permute.xlu0 %2331  ;;  %v4940_v45 = vpop.permute.xlu1 %2329 }
 0x44b   : > { %v2400_v21 = vsel %vm582_vm1, %v4940_v45, %v4927_v28  ;;  %p2988_p0 = pneg %p2987_p13 }
 0x44d   : > { %2503 = vmatpush1.bf16.msra.mxu1 %v2465_v12 }
 0x44e   : > { %v4935_v46 = vpop.permute.xlu0 %2335  ;;  %v4942_v33 = vpop.permute.xlu1 %2333 }
 0x450   : > { %2855 = vmatmul.mubr.msk.bf16.vlgmr.msra.gmra.mrb[8].mxu1 %vm771_vm9, %v4933_v30 }
 0x451   : > { %2602 = vmatprep.mubr.bf16.mxu1 %v5256_v41 }
 0x452   : > { %v2204_v47 = vpop.permute.xlu0 %2203  ;;  %v2240_v7 = vpop.permute.xlu1 %2239 }
 0x453   : > { %v2343_v10 = vsel %vm582_vm1, %v4784_v43, %v2204_v47  ;;  %v2359_v43 = vsel %vm582_vm1, %v4842_v9, %v2240_v7 }
 0x456   : > { %v2222_v63 = vpop.permute.xlu0 %2221  ;;  %v2276_v27 = vpop.permute.xlu1 %2275 }
 0x457   : > { %v2351_v23 = vsel %vm582_vm1, %v4815_v3, %v2222_v63  ;;  %v2375_v18 = vsel %vm582_vm1, %v4885_v37, %v2276_v27 }
 0x45a   : > { %v2258_v48 = vpop.permute.xlu0 %2257  ;;  %v2312_v0 = vpop.permute.xlu1 %2311 }
 0x45b   : > { %v2367_v3 = vsel %vm582_vm1, %v4859_v4, %v2258_v48  ;;  %v2391_v42 = vsel %vm582_vm1, %v4912_v62, %v2312_v0 }
 0x45e   : > { %v2294_v15 = vpop.permute.xlu0 %2293 }
 0x45f   : > { %v2383_v39 = vsel %vm582_vm1, %v4898_v19, %v2294_v15  ;;  %v2399_v19 = vsel %vm582_vm1, %v4786_v2, %v4940_v45 }
 0x460   : > { %v2471_v55 = vsel %vm942_vm2, %v2399_v19, 0  ;;  %v2978_v19 = vld [vmem:[%s3195_s25 + $0x8] sm:$0xff] }
 0x462   : > { %v2242_v20 = vpop.permute.xlu0 %2241 }
 0x463   : > { %v2360_v53 = vsel %vm582_vm1, %v2240_v7, %v2242_v20 }
 0x466   : > { %v4944_v8 = vpop.permute.xlu0 %2277 }
 0x467   : > { %v2376_v52 = vsel %vm582_vm1, %v2276_v27, %v4944_v8 }
 0x46a   : > { %v4946_v14 = vpop.permute.xlu0 %2313 }
 0x46b   : > { %v2392_v37 = vsel %vm582_vm1, %v2312_v0, %v4946_v14 }
 0x46e   : > { %v4948_v17 = vpop.permute.xlu0 %2209 }
 0x46f   : > { %v2206_v44 = vpop.permute.xlu1 %2205 }
 0x470   : > { %v2344_v58 = vsel %vm582_vm1, %v2204_v47, %v2206_v44 }
 0x471   : > { %2529 = vmatprep.subr.bf16.mxu0 %v2344_v58 }
 0x472   : > { %2530 = vmatpush1.bf16.msra.mxu0 %v2343_v10  ;;  %v4953_v34 = vpop.permute.xlu0 %2227 }
 0x473   : > { %v2224_v59 = vpop.permute.xlu1 %2223 }
 0x474   : > { %v2352_v51 = vsel %vm582_vm1, %v2222_v63, %v2224_v59 }
 0x475   : > { %2531 = vmatprep.subr.bf16.mxu0 %v2352_v51 }
 0x476   : > { %2532 = vmatpush1.bf16.msra.mxu0 %v2351_v23  ;;  %v4958_v36 = vpop.permute.xlu0 %2245 }
 0x477   : > { %v2260_v11 = vpop.permute.xlu1 %2259  ;;  %2533 = vmatprep.subr.bf16.mxu0 %v2360_v53 }
 0x478   : > { %v2368_v56 = vsel %vm582_vm1, %v2258_v48, %v2260_v11 }
 0x47a   : > { %2534 = vmatpush1.bf16.msra.mxu0 %v2359_v43  ;;  %v4963_v31 = vpop.permute.xlu0 %2263 }
 0x47b   : > { %v2296_v25 = vpop.permute.xlu1 %2295  ;;  %2535 = vmatprep.subr.bf16.mxu0 %v2368_v56 }
 0x47c   : > { %v2384_v5 = vsel %vm582_vm1, %v2294_v15, %v2296_v25  ;;  %v2402_v15 = vsel %vm582_vm1, %v4942_v33, %v4935_v46 }
 0x47e   : > { %2536 = vmatpush1.bf16.msra.mxu0 %v2367_v3  ;;  %v4968_v24 = vpop.permute.xlu0 %2281 }
 0x47f   : > { %v2208_v29 = vpop.permute.xlu1 %2207  ;;  %2537 = vmatprep.subr.bf16.mxu0 %v2376_v52 }
 0x480   : > { %v2345_v9 = vsel %vm582_vm1, %v2206_v44, %v2208_v29  ;;  %v2346_v1 = vsel %vm582_vm1, %v2208_v29, %v4948_v17 }
 0x481   : > { %2570 = vmatprep.subr.bf16.mxu1 %v2346_v1 }
 0x482   : > { %2538 = vmatpush1.bf16.msra.mxu0 %v2375_v18  ;;  %2571 = vmatpush1.bf16.msra.mxu1 %v2345_v9  ;;  %v4977_v4 = vpop.permute.xlu0 %2299 }
 0x483   : > { %v2226_v60 = vpop.permute.xlu1 %2225  ;;  %2539 = vmatprep.subr.bf16.mxu0 %v2384_v5 }
 0x484   : > { %v2353_v6 = vsel %vm582_vm1, %v2224_v59, %v2226_v60  ;;  %v2354_v50 = vsel %vm582_vm1, %v2226_v60, %v4953_v34 }
 0x485   : > { %2572 = vmatprep.subr.bf16.mxu1 %v2354_v50 }
 0x486   : > { %2540 = vmatpush1.bf16.msra.mxu0 %v2383_v39  ;;  %2573 = vmatpush1.bf16.msra.mxu1 %v2353_v6  ;;  %v4987_v32 = vpop.permute.xlu0 %2317 }
 0x487   : > { %v2244_v26 = vpop.permute.xlu1 %2243  ;;  %2541 = vmatprep.subr.bf16.mxu0 %v2392_v37 }
 0x488   : > { %v2361_v16 = vsel %vm582_vm1, %v2242_v20, %v2244_v26  ;;  %v2362_v57 = vsel %vm582_vm1, %v2244_v26, %v4958_v36 }
 0x489   : > { %2574 = vmatprep.subr.bf16.mxu1 %v2362_v57  ;;  %v2977_v57 = vld [vmem:[%s3195_s25] sm:$0xff] }
 0x48a   : > { %2542 = vmatpush1.bf16.msra.mxu0 %v2391_v42  ;;  %2575 = vmatpush1.bf16.msra.mxu1 %v2361_v16  ;;  %v2214_v62 = vpop.permute.xlu0 %2213 }
 0x48b   : > { %v2262_v61 = vpop.permute.xlu1 %2261  ;;  %2856 = vmatprep.subr.msk.bf16.mxu0 %vm942_vm2, %v2400_v21 }
 0x48c   : > { %v2369_v35 = vsel %vm582_vm1, %v2260_v11, %v2262_v61  ;;  %v2370_v22 = vsel %vm582_vm1, %v2262_v61, %v4963_v31 }
 0x48d   : > { %2576 = vmatprep.subr.bf16.mxu1 %v2370_v22 }
 0x48e   : > { %2544 = vmatpush1.bf16.msra.mxu0 %v2471_v55  ;;  %2577 = vmatpush1.bf16.msra.mxu1 %v2369_v35  ;;  %v2232_v40 = vpop.permute.xlu0 %2231 }
 0x48f   : > { %v2280_v2 = vpop.permute.xlu1 %2279 }
 0x490   : > { %v2377_v49 = vsel %vm582_vm1, %v4944_v8, %v2280_v2  ;;  %v2378_v13 = vsel %vm582_vm1, %v2280_v2, %v4968_v24 }
 0x491   : > { %2857 = vmatmul.mubr.msk.bf16.vlgmr.msra.gmra.mrb[12].mxu0 %vm771_vm9, %v4933_v30  ;;  %2578 = vmatprep.subr.bf16.mxu1 %v2378_v13 }
 0x492   : > { %2579 = vmatpush1.bf16.msra.mxu1 %v2377_v49  ;;  %2643 = vmatprep.mubr.bf16.mxu0 %v5256_v41  ;;  %v2250_v48 = vpop.permute.xlu0 %2249  ;;  %v2401_v41 = vsel %vm582_vm1, %v4927_v28, %v4942_v33 }
 0x493   : > { %v2298_v54 = vpop.permute.xlu1 %2297  ;;  %v2477_v8 = vsel %vm942_vm2, %v2401_v41, 0 }
 0x494   : > { %v2385_v38 = vsel %vm582_vm1, %v2296_v25, %v2298_v54  ;;  %v2386_v12 = vsel %vm582_vm1, %v2298_v54, %v4977_v4  ;;  %v2979_v54 = vld [vmem:[%s3195_s25 + $0x10] sm:$0xff] }
 0x495   : > { %2580 = vmatprep.subr.bf16.mxu1 %v2386_v12  ;;  %v2980_v12 = vld [vmem:[%s3195_s25 + $0x18] sm:$0xff] }
 0x496   : > { %2581 = vmatpush1.bf16.msra.mxu1 %v2385_v38 }
 0x497   : > { %v2316_v47 = vpop.permute.xlu1 %2315 }
 0x498   : > { %v2393_v45 = vsel %vm582_vm1, %v4946_v14, %v2316_v47  ;;  %v2394_v63 = vsel %vm582_vm1, %v2316_v47, %v4987_v32  ;;  %v2268_v14 = vpop.permute.xlu0 %2267 }
 0x499   : > { %2582 = vmatprep.subr.bf16.mxu1 %v2394_v63 }
 0x49a   : > { %2583 = vmatpush1.bf16.msra.mxu1 %v2393_v45 }
 0x49b   : > { %v2212_v7 = vpop.permute.xlu1 %2211  ;;  %2858 = vmatprep.subr.msk.bf16.mxu1 %vm942_vm2, %v2402_v15 }
 0x49c   : > { %v2347_v20 = vsel %vm582_vm1, %v4948_v17, %v2212_v7  ;;  %v2348_v27 = vsel %vm582_vm1, %v2212_v7, %v2214_v62  ;;  %v2286_v10 = vpop.permute.xlu0 %2285 }
 0x49d   : > { %2611 = vmatprep.subr.bf16.mxu0 %v2348_v27 }
 0x49e   : > { %2585 = vmatpush1.bf16.msra.mxu1 %v2477_v8  ;;  %2612 = vmatpush1.bf16.msra.mxu0 %v2347_v20 }
 0x49f   : > { %v2230_v28 = vpop.permute.xlu1 %2229 }
 0x4a0   : > { %v2355_v0 = vsel %vm582_vm1, %v4953_v34, %v2230_v28  ;;  %v2356_v33 = vsel %vm582_vm1, %v2230_v28, %v2232_v40  ;;  %v2304_v23 = vpop.permute.xlu0 %2303  ;;  %v2981_v28 = vld [vmem:[%s3195_s25 + $0x20] sm:$0xff] }
 0x4a1   : > { %2859 = vmatmul.mubr.msk.bf16.vlgmr.msra.gmra.mrb[12].mxu1 %vm771_vm9, %v4933_v30  ;;  %2613 = vmatprep.subr.bf16.mxu0 %v2356_v33  ;;  %v2982_v33 = vld [vmem:[%s3195_s25 + $0x28] sm:$0xff] }
 0x4a2   : > { %2614 = vmatpush1.bf16.msra.mxu0 %v2355_v0 }
 0x4a3   : > { %v2248_v17 = vpop.permute.xlu1 %2247 }
 0x4a4   : > { %v2363_v44 = vsel %vm582_vm1, %v4958_v36, %v2248_v17  ;;  %v2364_v58 = vsel %vm582_vm1, %v2248_v17, %v2250_v48 }
 0x4a5   : > { %2615 = vmatprep.subr.bf16.mxu0 %v2364_v58 }
 0x4a6   : > { %2616 = vmatpush1.bf16.msra.mxu0 %v2363_v44 }
 0x4a7   : > { %v2266_v59 = vpop.permute.xlu1 %2265 }
 0x4a8   : > { %v2371_v34 = vsel %vm582_vm1, %v4963_v31, %v2266_v59  ;;  %v2372_v51 = vsel %vm582_vm1, %v2266_v59, %v2268_v14  ;;  %v2322_v31 = vpop.permute.xlu0 %2321 }
 0x4a9   : > { %2617 = vmatprep.subr.bf16.mxu0 %v2372_v51 }
 0x4aa   : > { %2618 = vmatpush1.bf16.msra.mxu0 %v2371_v34 }
 0x4ab   : > { %v2284_v53 = vpop.permute.xlu1 %2283 }
 0x4ac   : > { %v2379_v11 = vsel %vm582_vm1, %v4968_v24, %v2284_v53  ;;  %v2380_v36 = vsel %vm582_vm1, %v2284_v53, %v2286_v10  ;;  %v2340_v29 = vpop.permute.xlu0 %2339 }
 0x4ad   : > { %2619 = vmatprep.subr.bf16.mxu0 %v2380_v36 }
 0x4ae   : > { %2620 = vmatpush1.bf16.msra.mxu0 %v2379_v11 }
 0x4af   : > { %v2302_v43 = vpop.permute.xlu1 %2301 }
 0x4b0   : > { %v2387_v56 = vsel %vm582_vm1, %v4977_v4, %v2302_v43  ;;  %v2388_v25 = vsel %vm582_vm1, %v2302_v43, %v2304_v23  ;;  %v2983_v43 = vld [vmem:[%s3195_s25 + $0x30] sm:$0xff] }
 0x4b1   : > { %2621 = vmatprep.subr.bf16.mxu0 %v2388_v25  ;;  %v2984_v25 = vld [vmem:[%s3195_s25 + $0x38] sm:$0xff]  ;;  %s3084_s25 = smov [#allocation2]  }
 0x4b2   : > { %2622 = vmatpush1.bf16.msra.mxu0 %v2387_v56  ;;  %s2989_s3 = sshll.u32 %s3084_s25, 4  ;;  %s2990_s3 = int_to_ptr.vmem [resolvable:$false] %s2989_s3 }
 0x4b3   : > { %v2320_v3 = vpop.permute.xlu1 %2319  ;;  %s2991_s26 = scalar_lea.vmem %s2990_s3, 2048  ;;  %p2992_p1 = scmp.lt.s32.totalorder %s5083_s18, %s2990_s3 }
 0x4b4   : > { %v2395_v52 = vsel %vm582_vm1, %v4987_v32, %v2320_v3  ;;  %v2396_v24 = vsel %vm582_vm1, %v2320_v3, %v2322_v31  ;;  %p2993_p2 = scmp.lt.s32.totalorder %s2991_s26, %s2985_s10 }
 0x4b5   : > { %2623 = vmatprep.subr.bf16.mxu0 %v2396_v24 }
 0x4b6   : > { %2624 = vmatpush1.bf16.msra.mxu0 %v2395_v52  ;;  %p2994_p3 = por %p2993_p2, %p2992_p1 }
 0x4b7   : > { %v2338_v9 = vpop.permute.xlu1 %2337  ;;  %v2670_v39 = vpop.permute.xlu0 %2669 }
 0x4b8   : > { %v2403_v1 = vsel %vm582_vm1, %v4935_v46, %v2338_v9  ;;  %v2404_v18 = vsel %vm582_vm1, %v2338_v9, %v2340_v29  ;;  %p2995_p5 = pnand %p2994_p3, %p2988_p0 }
 0x4b9   : > { %v2483_v4 = vsel %vm942_vm2, %v2403_v1, 0  ;;  %2860 = vmatprep.subr.msk.bf16.mxu0 %vm942_vm2, %v2404_v18 }
 0x4ba   : > { %2626 = vmatpush1.bf16.msra.mxu0 %v2483_v4 }
 0x4bd   : > { %2861 = vmatmul.mubr.msk.bf16.vlgmr.msra.gmra.mrb[16].mxu0 %vm771_vm9, %v4933_v30 }
 0x4c8   : > { %v2656_v5 = vpop.permute.xlu1 %2655 }
 0x523   : > { %v2522_v60 = vpop.f32.mrb[8].mxu1 }
 0x524   : > { %v2658_v6 = vmul.f32 %v2656_v5, %v2522_v60  ;;  %v2524_v50 = vpop.f32.mrb[9].mxu1 }
 0x525   : > { %v2659_v37 = vmul.f32 %v2656_v5, %v2524_v50  ;;  %v2526_v46 = vpop.f32.mrb[10].mxu1 }
 0x526   : > { %v2672_v32 = vadd.f32 %v2670_v39, %v2658_v6  ;;  %v2527_v26 = vpop.f32.mrb[11].mxu1 }
 0x527   : > { %v2673_v16 = vadd.f32 %v2670_v39, %v2659_v37 }
 0x528   : > { %v2680_v42 = vadd.f32 %v2977_v57, %v2672_v32 }
 0x529   : > { %v2681_v21 = vadd.f32 %v2978_v19, %v2673_v16 }
 0x52a   : > { %v2688_v30 = vmax.f32 %v2680_v42, 0.0 }
 0x52b   : > { %v2689_v61 = vmax.f32 %v2681_v21, 0.0 }
 0x52c   : > { %2696 = vst [vmem:[%s5062_s16] sm:$0xff] %v2688_v30 }
 0x52d   : > { %2697 = vst [vmem:[%s5062_s16 + $0x8] sm:$0xff] %v2689_v61 }
 0x564   : > { %v2563_v35 = vpop.f32.mrb[12].mxu0 }
 0x565   : > { %v2660_v22 = vmul.f32 %v2656_v5, %v2563_v35  ;;  %v2565_v55 = vpop.f32.mrb[13].mxu0 }
 0x566   : > { %v2661_v62 = vmul.f32 %v2656_v5, %v2565_v55  ;;  %v2567_v2 = vpop.f32.mrb[14].mxu0 }
 0x567   : > { %v2674_v49 = vadd.f32 %v2670_v39, %v2660_v22  ;;  %v2568_v13 = vpop.f32.mrb[15].mxu0 }
 0x568   : > { %v2675_v40 = vadd.f32 %v2670_v39, %v2661_v62 }
 0x569   : > { %v2682_v38 = vadd.f32 %v2979_v54, %v2674_v49 }
 0x56a   : > { %v2683_v47 = vadd.f32 %v2980_v12, %v2675_v40 }
 0x56b   : > { %v2690_v45 = vmax.f32 %v2682_v38, 0.0 }
 0x56c   : > { %v2691_v63 = vmax.f32 %v2683_v47, 0.0 }
 0x56d   : > { %2698 = vst [vmem:[%s5062_s16 + $0x10] sm:$0xff] %v2690_v45 }
 0x56e   : > { %2699 = vst [vmem:[%s5062_s16 + $0x18] sm:$0xff] %v2691_v63 }
 0x574   : > { %v2604_v48 = vpop.f32.mrb[12].mxu1 }
 0x575   : > { %v2662_v41 = vmul.f32 %v2656_v5, %v2604_v48  ;;  %v2606_v15 = vpop.f32.mrb[13].mxu1 }
 0x576   : > { %v2663_v7 = vmul.f32 %v2656_v5, %v2606_v15  ;;  %v2608_v20 = vpop.f32.mrb[14].mxu1 }
 0x577   : > { %v2676_v27 = vadd.f32 %v2670_v39, %v2662_v41  ;;  %v2609_v8 = vpop.f32.mrb[15].mxu1 }
 0x578   : > { %v2677_v14 = vadd.f32 %v2670_v39, %v2663_v7 }
 0x579   : > { %v2684_v0 = vadd.f32 %v2981_v28, %v2676_v27 }
 0x57a   : > { %v2685_v17 = vadd.f32 %v2982_v33, %v2677_v14 }
 0x57b   : > { %v2692_v44 = vmax.f32 %v2684_v0, 0.0 }
 0x57c   : > { %v2693_v58 = vmax.f32 %v2685_v17, 0.0 }
 0x57d   : > { %2700 = vst [vmem:[%s5062_s16 + $0x20] sm:$0xff] %v2692_v44 }
 0x57e   : > { %2701 = vst [vmem:[%s5062_s16 + $0x28] sm:$0xff] %v2693_v58 }
 0x590   : > { %v2645_v10 = vpop.f32.mrb[16].mxu0 }
 0x591   : > { %v2664_v59 = vmul.f32 %v2656_v5, %v2645_v10  ;;  %v2647_v34 = vpop.f32.mrb[17].mxu0 }
 0x592   : > { %v2665_v51 = vmul.f32 %v2656_v5, %v2647_v34  ;;  %v2649_v23 = vpop.f32.mrb[18].mxu0 }
 0x593   : > { %v2678_v53 = vadd.f32 %v2670_v39, %v2664_v59  ;;  %v2650_v11 = vpop.f32.mrb[19].mxu0 }
 0x594   : > { %v2679_v36 = vadd.f32 %v2670_v39, %v2665_v51 }
 0x595   : > { %v2686_v56 = vadd.f32 %v2983_v43, %v2678_v53 }
 0x596   : > { %v2687_v31 = vadd.f32 %v2984_v25, %v2679_v36 }
 0x597   : > { %v2694_v3 = vmax.f32 %v2686_v56, 0.0 }
 0x598   : > { %v2695_v52 = vmax.f32 %v2687_v31, 0.0 }
 0x599   : > { %2702 = vst [vmem:[%s5062_s16 + $0x30] sm:$0xff] %v2694_v3 }
 0x59a   : > { %2703 = vst [vmem:[%s5062_s16 + $0x38] sm:$0xff] %v2695_v52 }
 0x59b   : > { %2998 = shalt.err (!%p2995_p5)
}
 0x59c   : > { %s2999_s27 = scalar_lea.hbm %s5081_s0, 1024  ;;  %s3003_s14 = scalar_lea.hbm %s5141_s9, 2048 }
 0x59d   : > { %p3000_p6 = scmp.ne.s32.totalorder %s5081_s0, %s2999_s27  ;;  %p3004_p10 = scmp.lt.u32.totalorder %s5081_s0, %s5141_s9 }
 0x59e   : > { %p3005_p11 = scmp.lt.u32.totalorder %s3003_s14, %s2999_s27  ;;  %p3007_p13 = scmp.lt.u32.totalorder %s2999_s27, %s5081_s0 }
 0x59f   : > { %p3001_p7 = pnand %p3000_p6, %p3175_p4 }
 0x5a0   : > { %p3006_p12 = por %p3005_p11, %p3004_p10 }
 0x5a1   : > { %p3002_p9 = pneg %p3001_p7 }
 0x5a2   : > { %p3008_p0 = por %p3007_p13, %p3006_p12 }
 0x5a4   : > { %p3009_p1 = pnand %p3008_p0, %p3002_p9 }
 0x5a6   : > { %3012 = shalt.err (!%p3009_p1)
}
 0x5a7   : > { %2901 = dma.vmem_to_hbm [thread:$0]  (%p3175_p4), %s5083_s18, 1024, %s5081_s0, %s2705_s1  }
 0x5a8 PF: > { %p2907_p2 = scmp.ge.s32.totalorder %s3063_s12, 2  ;;  %s2733_s22 = sand.u32 1, %s3043_s28  }
 0x5a9   : > { %s2734_s23 = scalar_lea.sflag [#allocation3], %s2733_s22 }
 0x5aa   : > { %p2904_p3 = pnand %p2907_p2, %p3182_p8 }
 0x5ac   : > { %3038 = dma.done.wait (!%p2904_p3), %s2734_s23, 1024  }
 0x5ad   : > { %3040 = vsyncadd (!%p2904_p3), %s2734_s23, 4294966272  ;;  %s22_s12 = sadd.s32 1, %s3063_s12   ;;  %s5257_s28 = smov %s3047_s29 }
 0x5ae   : > { %p19_p5 = scmp.ge.s32.totalorder %s22_s12, 4   ;;  %s5258_s29 = smov %s3051_s30 }
 0x5af   : > { %s5259_s30 = smov %s3188_s20  ;;  %s5260_s10 = smov %s3059_s11 }
 0x5b0   : > { %s5261_s11 = smov %s5263_s15  ;;  %21 = sbr.rel (!%p19_p5) target bundleno = 7 (0x7), region = 97 }
 0x5b7   :  { %2739 = vsyncpa [#allocation3], 1 }
 0x5b8   :  { %2741 = vsyncpa [#allocation3 + $0x1], 1 }

</bundles_post_ra>
